<compile_context>
chip_gen: v6e
topology: v6e:2x2x1
jax: 0.10.0
libtpu: 0.0.40
codegen_flags: <defaults>
</compile_context>

<pallas_src>
import jax
import jax.numpy as jnp
from jax.experimental import pallas as pl
from jax.experimental.pallas import tpu as pltpu

N_EMBD = 384


def _round_up(x, m):
    return (x + m - 1) // m * m


def _ffn_kernel(x_ref, w1_ref, b1_ref, w2_ref, b2_ref, o_ref):
    # x_ref: (TM, C) bf16, w1_ref: (C, 4C) bf16, b1_ref: (1, 4C) f32,
    # w2_ref: (4C, C) bf16, b2_ref: (1, C) f32, o_ref: (TM, C) f32
    x = x_ref[...]

    # First linear + ReLU (MXU matmul, f32 accumulation)
    h = jnp.dot(x, w1_ref[...], preferred_element_type=jnp.float32)   # (TM, 4C)
    h = h + b1_ref[...]
    h = jnp.maximum(h, 0.0)

    # Second linear (cast activations back to bf16 for the MXU, accumulate in f32)
    y = jnp.dot(h.astype(jnp.bfloat16), w2_ref[...],
                preferred_element_type=jnp.float32)                   # (TM, C)
    y = y + b2_ref[...]

    # Dropout is identity in eval mode.
    o_ref[...] = y.astype(o_ref.dtype)


def feedforward_forward(x, w1, b1, w2, b2, *, tm=256):
    """x: (B, T, C) f32.  w1: (C, 4C), b1: (4C,), w2: (4C, C), b2: (C,).
    Weights are the transposed nn.Linear weights (in_features, out_features)."""
    B, T, C = x.shape
    H = w1.shape[1]
    assert w1.shape == (C, H) and w2.shape == (H, C)
    assert b1.shape == (H,) and b2.shape == (C,)
    assert C % 128 == 0 and H % 128 == 0, "lane dims must be multiples of 128"

    M = B * T
    tm = min(tm, _round_up(M, 8))          # sublane-aligned row tile
    m_pad = _round_up(M, tm)

    x2 = x.reshape(M, C).astype(jnp.bfloat16)
    if m_pad != M:
        x2 = jnp.pad(x2, ((0, m_pad - M), (0, 0)))
    w1b = w1.astype(jnp.bfloat16)
    w2b = w2.astype(jnp.bfloat16)
    b1r = b1.reshape(1, H).astype(jnp.float32)
    b2r = b2.reshape(1, C).astype(jnp.float32)

    grid = (m_pad // tm,)

    cost = pl.CostEstimate(
        flops=2 * m_pad * C * H + 2 * m_pad * H * C,
        transcendentals=0,
        bytes_accessed=(m_pad * C * 2              # x (bf16)
                        + C * H * 2 + H * C * 2    # weights (bf16)
                        + (H + C) * 4              # biases (f32)
                        + m_pad * C * 4),          # out (f32)
    )

    out = pl.pallas_call(
        _ffn_kernel,
        out_shape=jax.ShapeDtypeStruct((m_pad, C), jnp.float32),
        grid_spec=pltpu.PrefetchScalarGridSpec(
            num_scalar_prefetch=0,
            grid=grid,
            in_specs=[
                pl.BlockSpec((tm, C), lambda i: (i, 0)),    # x row tile (streams)
                pl.BlockSpec((C, H), lambda i: (0, 0)),     # W1 (VMEM-resident)
                pl.BlockSpec((1, H), lambda i: (0, 0)),     # b1
                pl.BlockSpec((H, C), lambda i: (0, 0)),     # W2 (VMEM-resident)
                pl.BlockSpec((1, C), lambda i: (0, 0)),     # b2
            ],
            out_specs=pl.BlockSpec((tm, C), lambda i: (i, 0)),
        ),
        compiler_params=pltpu.CompilerParams(
            dimension_semantics=("parallel",),
            vmem_limit_bytes=32 * 1024 * 1024,   # safe for v5e/v6e (128 MiB) and v7x (64 MiB)
        ),
        cost_estimate=cost,
    )(x2, w1b, b1r, w2b, b2r)

    return out[:M].reshape(B, T, C)


def feedforward_reference(x, w1, b1, w2, b2):
    """Pure-JAX f32 reference mirroring the PyTorch forward (eval mode)."""
    h = jnp.maximum(x @ w1 + b1, 0.0)
    return h @ w2 + b2


def feedforward_reference_bf16(x, w1, b1, w2, b2):
    """Reference with the same bf16-operand / f32-accumulate precision as the kernel."""
    xb = x.astype(jnp.bfloat16)
    h = jnp.dot(xb, w1.astype(jnp.bfloat16), preferred_element_type=jnp.float32) + b1
    h = jnp.maximum(h, 0.0)
    y = jnp.dot(h.astype(jnp.bfloat16), w2.astype(jnp.bfloat16),
                preferred_element_type=jnp.float32) + b2
    return y


if __name__ == "__main__":
    key = jax.random.PRNGKey(0)
    B, T, C = 2, 8, N_EMBD
    H = 4 * C

    k_x, k_w1, k_b1, k_w2, k_b2 = jax.random.split(key, 5)
    x = jax.random.normal(k_x, (B, T, C), dtype=jnp.float32)
    # nn.Linear default init: U(-1/sqrt(in_features), 1/sqrt(in_features)); stored transposed.
    bound1 = 1.0 / (C ** 0.5)
    bound2 = 1.0 / (H ** 0.5)
    w1 = jax.random.uniform(k_w1, (C, H), jnp.float32, -bound1, bound1)
    b1 = jax.random.uniform(k_b1, (H,), jnp.float32, -bound1, bound1)
    w2 = jax.random.uniform(k_w2, (H, C), jnp.float32, -bound2, bound2)
    b2 = jax.random.uniform(k_b2, (C,), jnp.float32, -bound2, bound2)

    out = feedforward_forward(x, w1, b1, w2, b2)
    out = jax.block_until_ready(out)

    ref_bf16 = feedforward_reference_bf16(x, w1, b1, w2, b2)
    ref_f32 = feedforward_reference(x, w1, b1, w2, b2)

    assert out.shape == (B, T, C)
    assert jnp.allclose(out, ref_bf16, atol=1e-2, rtol=1e-2), "mismatch vs bf16 reference"
    assert jnp.allclose(out, ref_f32, atol=7e-2, rtol=7e-2), "mismatch vs f32 reference"

    print("KERNEL_OK")
</pallas_src>

<mosaic_0001>
module attributes {stable_mosaic.version = 11 : i64} {
  func.func @_ffn_kernel(%arg0: i32, %arg1: memref<16x384xbf16, #tpu.memory_space<vmem>>, %arg2: memref<384x1536xbf16, #tpu.memory_space<vmem>>, %arg3: memref<1x1536xf32, #tpu.memory_space<vmem>>, %arg4: memref<1536x384xbf16, #tpu.memory_space<vmem>>, %arg5: memref<1x384xf32, #tpu.memory_space<vmem>>, %arg6: memref<16x384xf32, #tpu.memory_space<vmem>>) attributes {dimension_semantics = [#tpu.dimension_semantics<parallel>], iteration_bounds = array<i64: 1>, scalar_prefetch = 0 : i64, scratch_operands = 0 : i64, tpu.core_type = #tpu.core_type<tc>, window_params = [{transform_indices = @transform_0, window_bounds = array<i64: 16, 384>}, {pipeline_mode = #tpu.pipeline_mode<synchronous>, transform_indices = @transform_1, window_bounds = array<i64: 384, 1536>}, {pipeline_mode = #tpu.pipeline_mode<synchronous>, transform_indices = @transform_2, window_bounds = array<i64: 1, 1536>}, {pipeline_mode = #tpu.pipeline_mode<synchronous>, transform_indices = @transform_3, window_bounds = array<i64: 1536, 384>}, {pipeline_mode = #tpu.pipeline_mode<synchronous>, transform_indices = @transform_4, window_bounds = array<i64: 1, 384>}, {transform_indices = @transform_5, window_bounds = array<i64: 16, 384>}]} {
    %c0 = arith.constant 0 : index
    %c0_0 = arith.constant 0 : index
    %0 = vector.load %arg1[%c0, %c0_0] : memref<16x384xbf16, #tpu.memory_space<vmem>>, vector<16x384xbf16>
    %c0_1 = arith.constant 0 : index
    %c0_2 = arith.constant 0 : index
    %1 = vector.load %arg2[%c0_1, %c0_2] : memref<384x1536xbf16, #tpu.memory_space<vmem>>, vector<384x1536xbf16>
    %cst = arith.constant dense<0.000000e+00> : vector<16x1536xf32>
    %2 = tpu.matmul %0, %1, %cst {dimension_numbers = #tpu.dot_dimension_numbers<[1], [0], [0], [1], [0, 0, 1, 1], [], []>} : vector<16x384xbf16>, vector<384x1536xbf16>, vector<16x1536xf32> -> vector<16x1536xf32>
    %c0_3 = arith.constant 0 : index
    %c0_4 = arith.constant 0 : index
    %3 = vector.load %arg3[%c0_3, %c0_4] : memref<1x1536xf32, #tpu.memory_space<vmem>>, vector<1x1536xf32>
    %4 = vector.broadcast %3 : vector<1x1536xf32> to vector<16x1536xf32>
    %5 = arith.addf %2, %4 : vector<16x1536xf32>
    %cst_5 = arith.constant 0.000000e+00 : f32
    %6 = vector.broadcast %cst_5 : f32 to vector<16x1536xf32>
    %7 = arith.maximumf %5, %6 : vector<16x1536xf32>
    %8 = arith.truncf %7 : vector<16x1536xf32> to vector<16x1536xbf16>
    %c0_6 = arith.constant 0 : index
    %c0_7 = arith.constant 0 : index
    %9 = vector.load %arg4[%c0_6, %c0_7] : memref<1536x384xbf16, #tpu.memory_space<vmem>>, vector<1536x384xbf16>
    %cst_8 = arith.constant dense<0.000000e+00> : vector<16x384xf32>
    %10 = tpu.matmul %8, %9, %cst_8 {dimension_numbers = #tpu.dot_dimension_numbers<[1], [0], [0], [1], [0, 0, 1, 1], [], []>} : vector<16x1536xbf16>, vector<1536x384xbf16>, vector<16x384xf32> -> vector<16x384xf32>
    %c0_9 = arith.constant 0 : index
    %c0_10 = arith.constant 0 : index
    %11 = vector.load %arg5[%c0_9, %c0_10] : memref<1x384xf32, #tpu.memory_space<vmem>>, vector<1x384xf32>
    %12 = vector.broadcast %11 : vector<1x384xf32> to vector<16x384xf32>
    %13 = arith.addf %10, %12 : vector<16x384xf32>
    %c0_11 = arith.constant 0 : index
    %c0_12 = arith.constant 0 : index
    %14 = vector.load %arg6[%c0_11, %c0_12] : memref<16x384xf32, #tpu.memory_space<vmem>>, vector<16x384xf32>
    tpu.vector_store %arg6[%c0_11, %c0_12], %13 {strides = array<i32>} : memref<16x384xf32, #tpu.memory_space<vmem>>, vector<16x384xf32>,
    return
  }
  func.func @transform_0(%arg0: i32) -> (i32, i32) {
    %c0_i32 = arith.constant 0 : i32
    %c0_i32_0 = arith.constant 0 : i32
    return %arg0, %c0_i32 : i32, i32
  }
  func.func @transform_1(%arg0: i32) -> (i32, i32) {
    %c0_i32 = arith.constant 0 : i32
    %c0_i32_0 = arith.constant 0 : i32
    %c0_i32_1 = arith.constant 0 : i32
    return %c0_i32, %c0_i32_0 : i32, i32
  }
  func.func @transform_2(%arg0: i32) -> (i32, i32) {
    %c0_i32 = arith.constant 0 : i32
    %c0_i32_0 = arith.constant 0 : i32
    %c0_i32_1 = arith.constant 0 : i32
    return %c0_i32, %c0_i32_0 : i32, i32
  }
  func.func @transform_3(%arg0: i32) -> (i32, i32) {
    %c0_i32 = arith.constant 0 : i32
    %c0_i32_0 = arith.constant 0 : i32
    %c0_i32_1 = arith.constant 0 : i32
    return %c0_i32, %c0_i32_0 : i32, i32
  }
  func.func @transform_4(%arg0: i32) -> (i32, i32) {
    %c0_i32 = arith.constant 0 : i32
    %c0_i32_0 = arith.constant 0 : i32
    %c0_i32_1 = arith.constant 0 : i32
    return %c0_i32, %c0_i32_0 : i32, i32
  }
  func.func @transform_5(%arg0: i32) -> (i32, i32) {
    %c0_i32 = arith.constant 0 : i32
    %c0_i32_0 = arith.constant 0 : i32
    return %arg0, %c0_i32 : i32, i32
  }
}

</mosaic_0001>

<bundles_post_ra>
// kernel: tpu_custom_call.1
= control target key start
LH: loop header
LB: loop body
LE: loop exit
PB: predicated region body
PF: predicated region fallthrough
CT: control target
= control target key end

     0   :  { %10 = vsyncpa [#allocation3], 0  ;;  %s6820_s0 = inlined_call_operand.hbm [shape: bf16[16,384], index: 0, kind: input, shape index: {}]   ;;  %s6821_s1 = inlined_call_operand.hbm [shape: bf16[384,1536], index: 1, kind: input, shape index: {}]   ;;  %s6822_s2 = inlined_call_operand.hbm [shape: f32[1,1536], index: 2, kind: input, shape index: {}]   ;;  %s6823_s3 = inlined_call_operand.hbm [shape: bf16[1536,384], index: 3, kind: input, shape index: {}]   ;;  %s6824_s4 = inlined_call_operand.hbm [shape: f32[1,384], index: 4, kind: input, shape index: {}]   ;;  %s6825_s5 = inlined_call_operand.hbm [shape: f32[16,384], index: 5, kind: output, shape index: {}]  }
   0x1   :  { %11 = vsyncpa [#allocation6], 0 }
   0x2   :  { %12 = vsyncpa [#allocation9], 0 }
   0x3   :  { %13 = vsyncpa [#allocation4], 0  ;;  %s6592_s18 = smov [#allocation5]  }
   0x4   :  { %s31_s19 = sshll.u32 %s6592_s18, 4  ;;  %s32_s19 = int_to_ptr.vmem [resolvable:$true] %s31_s19 }
   0x5   :  { %s6472_s20 = scalar_lea.vmem %s32_s19, 36864  ;;  %p6477_p1 = scmp.lt.s32.totalorder %s32_s19, %s32_s19 }
   0x6   :  { %p6473_p0 = scmp.ne.s32.totalorder %s32_s19, %s6472_s20  ;;  %p6478_p2 = scmp.lt.s32.totalorder %s6472_s20, %s6472_s20 }
   0x8   :  { %p6479_p3 = por %p6478_p2, %p6477_p1 }
   0xa   :  { %p6480_p4 = pnand %p6479_p3, %p6473_p0 }
   0xc   :  { %6483 = shalt.err (!%p6480_p4)
}
   0xd   :  { %s6593_s21 = smov 768   ;;  %s6594_s22 = smov 48  }
   0xe   :  { %37 = dma.hbm_to_vmem [thread:$0]  %s6821_s1, 36864, %s32_s19, [#allocation6], %s6593_s21, %s6593_s21, %s6594_s22  }
   0xf   :  { %s6595_s25 = smov [#allocation8]   ;;  %s6596_s27 = smov [#allocation2]  }
  0x10   :  { %s53_s26 = sshll.u32 %s6595_s25, 4  ;;  %s19_s28 = sshll.u32 %s6596_s27, 4  ;;  %s54_s26 = int_to_ptr.vmem [resolvable:$true] %s53_s26  ;;  %s20_s28 = int_to_ptr.vmem [resolvable:$true] %s19_s28 }
  0x11   :  { %s6492_s29 = scalar_lea.vmem %s54_s26, 36864  ;;  %p6497_p6 = scmp.lt.s32.totalorder %s54_s26, %s54_s26 }
  0x12   :  { %p6493_p5 = scmp.ne.s32.totalorder %s54_s26, %s6492_s29  ;;  %p6498_p7 = scmp.lt.s32.totalorder %s6492_s29, %s6492_s29 }
  0x14   :  { %p6499_p8 = por %p6498_p7, %p6497_p6 }
  0x16   :  { %p6500_p9 = pnand %p6499_p8, %p6493_p5 }
  0x18   :  { %6503 = shalt.err (!%p6500_p9)
}
  0x19   :  { %s6597_s30 = smov 192   ;;  %s6598_s6 = smov 12  }
  0x1a   :  { %59 = dma.hbm_to_vmem [thread:$0]  %s6823_s3, 36864, %s54_s26, [#allocation9], %s6597_s30, %s6597_s30, %s6598_s6  }
  0x1b   :  { %s6512_s1 = scalar_lea.vmem %s20_s28, 384  ;;  %p6517_p11 = scmp.lt.s32.totalorder %s20_s28, %s20_s28 }
  0x1c   :  { %p6513_p10 = scmp.ne.s32.totalorder %s20_s28, %s6512_s1  ;;  %p6518_p12 = scmp.lt.s32.totalorder %s6512_s1, %s6512_s1 }
  0x1e   :  { %p6519_p13 = por %p6518_p12, %p6517_p11 }
  0x20   :  { %p6520_p0 = pnand %p6519_p13, %p6513_p10 }
  0x22   :  { %6523 = shalt.err (!%p6520_p0)
}
  0x23   :  { %25 = dma.hbm_to_vmem [thread:$0]  %s6820_s0, 384, %s20_s28, [#allocation3], %s6597_s30, %s6597_s30, %s6598_s6  }
  0x24   :  { %s6599_s11 = smov [#allocation7]   ;;  %s6600_s13 = smov [#allocation10]  }
  0x25   :  { %s44_s12 = sshll.u32 %s6599_s11, 4  ;;  %s66_s14 = sshll.u32 %s6600_s13, 4  ;;  %s45_s12 = int_to_ptr.vmem [resolvable:$true] %s44_s12  ;;  %s67_s14 = int_to_ptr.vmem [resolvable:$true] %s66_s14 }
  0x26   :  { %s6532_s15 = scalar_lea.vmem %s45_s12, 192  ;;  %p6537_p2 = scmp.lt.s32.totalorder %s45_s12, %s45_s12 }
  0x27   :  { %p6533_p1 = scmp.ne.s32.totalorder %s45_s12, %s6532_s15  ;;  %p6538_p3 = scmp.lt.s32.totalorder %s6532_s15, %s6532_s15 }
  0x29   :  { %p6539_p4 = por %p6538_p3, %p6537_p2 }
  0x2b   :  { %p6540_p5 = pnand %p6539_p4, %p6533_p1 }
  0x2d   :  { %6543 = shalt.err (!%p6540_p5)
}
  0x2e   :  { %47 = dma.hbm_to_vmem [thread:$0]  %s6822_s2, 192, %s45_s12, [#allocation6]  }
  0x2f   :  { %s6552_s17 = scalar_lea.vmem %s67_s14, 48  ;;  %s6556_s0 = scalar_lea.vmem %s67_s14, 64 }
  0x30   :  { %p6553_p6 = scmp.ne.s32.totalorder %s67_s14, %s6552_s17  ;;  %p6557_p7 = scmp.lt.s32.totalorder %s67_s14, %s67_s14 }
  0x31   :  { %p6558_p8 = scmp.lt.s32.totalorder %s6556_s0, %s6552_s17 }
  0x33   :  { %p6559_p9 = por %p6558_p8, %p6557_p7 }
  0x35   :  { %p6560_p10 = pnand %p6559_p9, %p6553_p6 }
  0x37   :  { %6563 = shalt.err (!%p6560_p10)
}
  0x38   :  { %69 = dma.hbm_to_vmem [thread:$0]  %s6824_s4, 48, %s67_s14, [#allocation9]  }
  0x39   :  { %6584 = dma.done.wait [#allocation3], 384  }
  0x3a   :  { %6585 = vsyncadd [#allocation3], 4294966912 }
  0x3b   :  { %6586 = dma.done.wait [#allocation6], 37056  }
  0x3c   :  { %6587 = vsyncadd [#allocation6], 4294930240 }
  0x3d   :  { %6588 = dma.done.wait [#allocation9], 36912  }
  0x3e   :  { %6589 = vsyncadd [#allocation9], 4294930384  ;;  %v6601_v0 = vmov 0   ;;  %v5640_v1 = vld [vmem:[#allocation5 + $0x2a4] ss:$48 sps:$4 sm:$0xff]   ;;  %s6602_s2 = smov [#allocation11]  }
  0x3f   :  { %1973 = vmatprep.mubr.bf16.mxu1 %v6601_v0  ;;  %v5642_v2 = vld [vmem:[#allocation5 + $0x8a4] ss:$48 sps:$4 sm:$0xff]   ;;  %1898 = vmatprep.subr.bf16.mxu0 %v5640_v1  ;;  %v5644_v3 = vld [vmem:[#allocation5 + $0x2a0] ss:$48 sps:$4 sm:$0xff]   ;;  %v5693_v34 = vld [vmem:[#allocation5 + $0x2ac] ss:$48 sps:$4 sm:$0xff]  }
  0x40   :  { %v5645_v4 = vld [vmem:[#allocation5 + $0x8a0] ss:$48 sps:$4 sm:$0xff]   ;;  %1941 = vmatprep.subr.bf16.mxu1 %v5642_v2  ;;  %v5646_v5 = vld [vmem:[#allocation5 + $0x244] ss:$48 sps:$4 sm:$0xff]   ;;  %1899 = vmatpush1.bf16.msra.mxu0 %v5644_v3  ;;  %v5691_v36 = vld [vmem:[#allocation5 + $0x2a8] ss:$48 sps:$4 sm:$0xff]  }
  0x41   :  { %1942 = vmatpush1.bf16.msra.mxu1 %v5645_v4  ;;  %v5648_v6 = vld [vmem:[#allocation5 + $0x844] ss:$48 sps:$4 sm:$0xff]   ;;  %v5650_v7 = vld [vmem:[#allocation5 + $0x240] ss:$48 sps:$4 sm:$0xff]   ;;  %1900 = vmatprep.subr.bf16.mxu0 %v5646_v5  ;;  %v5699_v39 = vld [vmem:[#allocation5 + $0x24c] ss:$48 sps:$4 sm:$0xff]  }
  0x42   :  { %v5651_v8 = vld [vmem:[#allocation5 + $0x840] ss:$48 sps:$4 sm:$0xff]   ;;  %1943 = vmatprep.subr.bf16.mxu1 %v5648_v6  ;;  %v5652_v9 = vld [vmem:[#allocation5 + $0x1e4] ss:$48 sps:$4 sm:$0xff]   ;;  %v5697_v40 = vld [vmem:[#allocation5 + $0x248] ss:$48 sps:$4 sm:$0xff]  }
  0x43   :  { %v5654_v10 = vld [vmem:[#allocation5 + $0x7e4] ss:$48 sps:$4 sm:$0xff]   ;;  %v5656_v11 = vld [vmem:[#allocation5 + $0x1e0] ss:$48 sps:$4 sm:$0xff]   ;;  %v5705_v43 = vld [vmem:[#allocation5 + $0x1ec] ss:$48 sps:$4 sm:$0xff]  }
  0x44   :  { %v5657_v12 = vld [vmem:[#allocation5 + $0x7e0] ss:$48 sps:$4 sm:$0xff]   ;;  %1901 = vmatpush1.bf16.msra.mxu0 %v5650_v7  ;;  %v5658_v13 = vld [vmem:[#allocation5 + $0x184] ss:$48 sps:$4 sm:$0xff]   ;;  %v5703_v44 = vld [vmem:[#allocation5 + $0x1e8] ss:$48 sps:$4 sm:$0xff]  }
  0x45   :  { %1944 = vmatpush1.bf16.msra.mxu1 %v5651_v8  ;;  %1902 = vmatprep.subr.bf16.mxu0 %v5652_v9  ;;  %v5660_v14 = vld [vmem:[#allocation5 + $0x784] ss:$48 sps:$4 sm:$0xff]   ;;  %v5662_v15 = vld [vmem:[#allocation5 + $0x180] ss:$48 sps:$4 sm:$0xff]   ;;  %v5711_v47 = vld [vmem:[#allocation5 + $0x18c] ss:$48 sps:$4 sm:$0xff]  }
  0x46   :  { %1945 = vmatprep.subr.bf16.mxu1 %v5654_v10  ;;  %v5663_v16 = vld [vmem:[#allocation5 + $0x780] ss:$48 sps:$4 sm:$0xff]   ;;  %v5664_v17 = vld [vmem:[#allocation5 + $0x124] ss:$48 sps:$4 sm:$0xff]   ;;  %v5709_v48 = vld [vmem:[#allocation5 + $0x188] ss:$48 sps:$4 sm:$0xff]  }
  0x47   :  { %v5666_v18 = vld [vmem:[#allocation5 + $0x724] ss:$48 sps:$4 sm:$0xff]   ;;  %v5668_v19 = vld [vmem:[#allocation5 + $0x120] ss:$48 sps:$4 sm:$0xff]   ;;  %v6654_v51 = vld [vmem:[#allocation2 + $0x4] ss:$12 sps:$4 sm:$0xff]  }
  0x48   :  { %1903 = vmatpush1.bf16.msra.mxu0 %v5656_v11  ;;  %v5669_v20 = vld [vmem:[#allocation5 + $0x720] ss:$48 sps:$4 sm:$0xff]   ;;  %v5670_v21 = vld [vmem:[#allocation5 + $0xc4] ss:$48 sps:$4 sm:$0xff]   ;;  %v5717_v52 = vld [vmem:[#allocation5 + $0x12c] ss:$48 sps:$4 sm:$0xff]   ;;  %1930 = vmatprep.mubr.bf16.mxu0 %v6654_v51 }
  0x49   :  { %1946 = vmatpush1.bf16.msra.mxu1 %v5657_v12  ;;  %1904 = vmatprep.subr.bf16.mxu0 %v5658_v13  ;;  %v5672_v22 = vld [vmem:[#allocation5 + $0x6c4] ss:$48 sps:$4 sm:$0xff]   ;;  %v5674_v23 = vld [vmem:[#allocation5 + $0xc0] ss:$48 sps:$4 sm:$0xff]   ;;  %v5715_v53 = vld [vmem:[#allocation5 + $0x128] ss:$48 sps:$4 sm:$0xff]  }
  0x4a   :  { %1947 = vmatprep.subr.bf16.mxu1 %v5660_v14  ;;  %v5675_v24 = vld [vmem:[#allocation5 + $0x6c0] ss:$48 sps:$4 sm:$0xff]   ;;  %v5676_v25 = vld [vmem:[#allocation5 + $0x64] ss:$48 sps:$4 sm:$0xff]   ;;  %v5723_v56 = vld [vmem:[#allocation5 + $0xcc] ss:$48 sps:$4 sm:$0xff]  }
  0x4b   :  { %v5678_v26 = vld [vmem:[#allocation5 + $0x664] ss:$48 sps:$4 sm:$0xff]   ;;  %v5680_v27 = vld [vmem:[#allocation5 + $0x60] ss:$48 sps:$4 sm:$0xff]   ;;  %v5721_v57 = vld [vmem:[#allocation5 + $0xc8] ss:$48 sps:$4 sm:$0xff]  }
  0x4c   :  { %1905 = vmatpush1.bf16.msra.mxu0 %v5662_v15  ;;  %v5681_v28 = vld [vmem:[#allocation5 + $0x660] ss:$48 sps:$4 sm:$0xff]   ;;  %v5682_v29 = vld [vmem:[#allocation5 + $0x4] ss:$48 sps:$4 sm:$0xff]   ;;  %v5729_v60 = vld [vmem:[#allocation5 + $0x6c] ss:$48 sps:$4 sm:$0xff]  }
  0x4d   :  { %1948 = vmatpush1.bf16.msra.mxu1 %v5663_v16  ;;  %1906 = vmatprep.subr.bf16.mxu0 %v5664_v17  ;;  %v5684_v30 = vld [vmem:[#allocation5 + $0x604] ss:$48 sps:$4 sm:$0xff]   ;;  %v5686_v31 = vld [vmem:[#allocation5] ss:$48 sps:$4 sm:$0xff]   ;;  %v5727_v61 = vld [vmem:[#allocation5 + $0x68] ss:$48 sps:$4 sm:$0xff]  }
  0x4e   :  { %1949 = vmatprep.subr.bf16.mxu1 %v5666_v18  ;;  %v5687_v32 = vld [vmem:[#allocation5 + $0x600] ss:$48 sps:$4 sm:$0xff]   ;;  %v5688_v33 = vld [vmem:[#allocation5 + $0x5a4] ss:$48 sps:$4 sm:$0xff]   ;;  %v5735_v1 = vld [vmem:[#allocation5 + $0xc] ss:$48 sps:$4 sm:$0xff]  }
  0x4f   :  { %v6651_v35 = vld [vmem:[#allocation2 + $0x8] ss:$12 sps:$4 sm:$0xff]   ;;  %v5695_v38 = vld [vmem:[#allocation5 + $0x544] ss:$48 sps:$4 sm:$0xff]   ;;  %v5733_v2 = vld [vmem:[#allocation5 + $0x8] ss:$48 sps:$4 sm:$0xff]  }
  0x50   :  { %1907 = vmatpush1.bf16.msra.mxu0 %v5668_v19  ;;  %v5694_v37 = vld [vmem:[#allocation5 + $0x5a0] ss:$48 sps:$4 sm:$0xff]   ;;  %v5701_v42 = vld [vmem:[#allocation5 + $0x4e4] ss:$48 sps:$4 sm:$0xff]   ;;  %v5742_v4 = vld [vmem:[#allocation5 + $0x5ac] ss:$48 sps:$4 sm:$0xff]  }
  0x51   :  { %1950 = vmatpush1.bf16.msra.mxu1 %v5669_v20  ;;  %1908 = vmatprep.subr.bf16.mxu0 %v5670_v21  ;;  %v5700_v41 = vld [vmem:[#allocation5 + $0x540] ss:$48 sps:$4 sm:$0xff]   ;;  %v5707_v46 = vld [vmem:[#allocation5 + $0x484] ss:$48 sps:$4 sm:$0xff]   ;;  %v5745_v5 = vld [vmem:[#allocation5 + $0x8ac] ss:$48 sps:$4 sm:$0xff]  }
  0x52   :  { %1951 = vmatprep.subr.bf16.mxu1 %v5672_v22  ;;  %v5706_v45 = vld [vmem:[#allocation5 + $0x4e0] ss:$48 sps:$4 sm:$0xff]   ;;  %v5713_v50 = vld [vmem:[#allocation5 + $0x424] ss:$48 sps:$4 sm:$0xff]   ;;  %v5740_v7 = vld [vmem:[#allocation5 + $0x5a8] ss:$48 sps:$4 sm:$0xff]  }
  0x53   :  { %v5712_v49 = vld [vmem:[#allocation5 + $0x480] ss:$48 sps:$4 sm:$0xff]   ;;  %v5719_v55 = vld [vmem:[#allocation5 + $0x3c4] ss:$48 sps:$4 sm:$0xff]   ;;  %v5743_v8 = vld [vmem:[#allocation5 + $0x8a8] ss:$48 sps:$4 sm:$0xff]  }
  0x54   :  { %1909 = vmatpush1.bf16.msra.mxu0 %v5674_v23  ;;  %v5718_v54 = vld [vmem:[#allocation5 + $0x420] ss:$48 sps:$4 sm:$0xff]   ;;  %v5725_v59 = vld [vmem:[#allocation5 + $0x364] ss:$48 sps:$4 sm:$0xff]   ;;  %v5748_v9 = vld [vmem:[#allocation5 + $0x54c] ss:$48 sps:$4 sm:$0xff]  }
  0x55   :  { %1952 = vmatpush1.bf16.msra.mxu1 %v5675_v24  ;;  %1910 = vmatprep.subr.bf16.mxu0 %v5676_v25  ;;  %v5724_v58 = vld [vmem:[#allocation5 + $0x3c0] ss:$48 sps:$4 sm:$0xff]   ;;  %v5731_v63 = vld [vmem:[#allocation5 + $0x304] ss:$48 sps:$4 sm:$0xff]   ;;  %v5751_v10 = vld [vmem:[#allocation5 + $0x84c] ss:$48 sps:$4 sm:$0xff]  }
  0x56   :  { %1953 = vmatprep.subr.bf16.mxu1 %v5678_v26  ;;  %v5730_v62 = vld [vmem:[#allocation5 + $0x360] ss:$48 sps:$4 sm:$0xff]   ;;  %v6658_v6 = vld [vmem:[#allocation2] ss:$12 sps:$4 sm:$0xff]   ;;  %v5754_v13 = vld [vmem:[#allocation5 + $0x4ec] ss:$48 sps:$4 sm:$0xff]  }
  0x57   :  { %v5736_v3 = vld [vmem:[#allocation5 + $0x300] ss:$48 sps:$4 sm:$0xff]   ;;  %v5746_v11 = vld [vmem:[#allocation5 + $0x548] ss:$48 sps:$4 sm:$0xff]   ;;  %v5757_v14 = vld [vmem:[#allocation5 + $0x7ec] ss:$48 sps:$4 sm:$0xff]  }
  0x58   :  { %1911 = vmatpush1.bf16.msra.mxu0 %v5680_v27  ;;  %v5749_v12 = vld [vmem:[#allocation5 + $0x848] ss:$48 sps:$4 sm:$0xff]   ;;  %v5760_v17 = vld [vmem:[#allocation5 + $0x48c] ss:$48 sps:$4 sm:$0xff]   ;;  %s4902_s4 = sshll.u32 %s6602_s2, 4  ;;  %s4903_s4 = int_to_ptr.vmem [resolvable:$true] %s4902_s4 }
  0x59   :  { %1954 = vmatpush1.bf16.msra.mxu1 %v5681_v28  ;;  %1912 = vmatprep.subr.bf16.mxu0 %v5682_v29  ;;  %v5752_v15 = vld [vmem:[#allocation5 + $0x4e8] ss:$48 sps:$4 sm:$0xff]   ;;  %v5763_v18 = vld [vmem:[#allocation5 + $0x78c] ss:$48 sps:$4 sm:$0xff]   ;;  %s6564_s20 = scalar_lea.vmem %s4903_s4, 768  ;;  %p6569_p12 = scmp.lt.s32.totalorder %s4903_s4, %s4903_s4 }
  0x5a   :  { %1955 = vmatprep.subr.bf16.mxu1 %v5684_v30  ;;  %v5755_v16 = vld [vmem:[#allocation5 + $0x7e8] ss:$48 sps:$4 sm:$0xff]   ;;  %v5766_v21 = vld [vmem:[#allocation5 + $0x42c] ss:$48 sps:$4 sm:$0xff]   ;;  %p6565_p11 = scmp.ne.s32.totalorder %s4903_s4, %s6564_s20  ;;  %p6570_p13 = scmp.lt.s32.totalorder %s6564_s20, %s6564_s20 }
  0x5b   :  { %v5758_v19 = vld [vmem:[#allocation5 + $0x488] ss:$48 sps:$4 sm:$0xff]   ;;  %v5769_v22 = vld [vmem:[#allocation5 + $0x72c] ss:$48 sps:$4 sm:$0xff]  }
  0x5c   :  { %1913 = vmatpush1.bf16.msra.mxu0 %v5686_v31  ;;  %v5761_v20 = vld [vmem:[#allocation5 + $0x788] ss:$48 sps:$4 sm:$0xff]   ;;  %v5772_v25 = vld [vmem:[#allocation5 + $0x3cc] ss:$48 sps:$4 sm:$0xff]   ;;  %p6571_p0 = por %p6570_p13, %p6569_p12 }
  0x5d   :  { %1956 = vmatpush1.bf16.msra.mxu1 %v5687_v32  ;;  %1914 = vmatprep.subr.bf16.mxu0 %v5688_v33  ;;  %v5764_v23 = vld [vmem:[#allocation5 + $0x428] ss:$48 sps:$4 sm:$0xff]   ;;  %v5775_v26 = vld [vmem:[#allocation5 + $0x6cc] ss:$48 sps:$4 sm:$0xff]  }
  0x5e   :  { %1984 = vmatprep.subr.bf16.mxu1 %v5693_v34  ;;  %v5767_v24 = vld [vmem:[#allocation5 + $0x728] ss:$48 sps:$4 sm:$0xff]   ;;  %v5778_v29 = vld [vmem:[#allocation5 + $0x36c] ss:$48 sps:$4 sm:$0xff]   ;;  %p6572_p1 = pnand %p6571_p0, %p6565_p11 }
  0x5f   :  { %v5770_v27 = vld [vmem:[#allocation5 + $0x3c8] ss:$48 sps:$4 sm:$0xff]   ;;  %v5781_v30 = vld [vmem:[#allocation5 + $0x66c] ss:$48 sps:$4 sm:$0xff]  }
  0x60   :  { %1974 = vmatmul.mubr.bf16.vlgmr.msra.gmra.mxu1 %v6651_v35  ;;  %1915 = vmatpush2.bf16.msra.mxu0 %v5694_v37  ;;  %v5773_v28 = vld [vmem:[#allocation5 + $0x6c8] ss:$48 sps:$4 sm:$0xff]   ;;  %v5784_v33 = vld [vmem:[#allocation5 + $0x30c] ss:$48 sps:$4 sm:$0xff]  }
  0x61   :  { %1985 = vmatpush1.bf16.msra.mxu1 %v5691_v36  ;;  %1916 = vmatprep.subr.bf16.mxu0 %v5695_v38  ;;  %v5776_v31 = vld [vmem:[#allocation5 + $0x368] ss:$48 sps:$4 sm:$0xff]   ;;  %v5787_v34 = vld [vmem:[#allocation5 + $0x60c] ss:$48 sps:$4 sm:$0xff]   ;;  %v5790_v38 = vld [vmem:[#allocation5 + $0x2b4] ss:$48 sps:$4 sm:$0xff]  }
  0x62   :  { %1986 = vmatprep.subr.bf16.mxu1 %v5699_v39  ;;  %2016 = vmatprep.mubr.bf16.mxu1 %v6654_v51  ;;  %v5779_v32 = vld [vmem:[#allocation5 + $0x668] ss:$48 sps:$4 sm:$0xff]   ;;  %v5793_v39 = vld [vmem:[#allocation5 + $0x8b4] ss:$48 sps:$4 sm:$0xff]  }
  0x63   :  { %v5782_v36 = vld [vmem:[#allocation5 + $0x308] ss:$48 sps:$4 sm:$0xff]  }
  0x64   :  { %1917 = vmatpush2.bf16.msra.mxu0 %v5700_v41  ;;  %v5785_v37 = vld [vmem:[#allocation5 + $0x608] ss:$48 sps:$4 sm:$0xff]   ;;  %v5791_v41 = vld [vmem:[#allocation5 + $0x8b0] ss:$48 sps:$4 sm:$0xff]  }
  0x65   :  { %1987 = vmatpush1.bf16.msra.mxu1 %v5697_v40  ;;  %1918 = vmatprep.subr.bf16.mxu0 %v5701_v42  ;;  %v5788_v40 = vld [vmem:[#allocation5 + $0x2b0] ss:$48 sps:$4 sm:$0xff]   ;;  %v5796_v42 = vld [vmem:[#allocation5 + $0x254] ss:$48 sps:$4 sm:$0xff]  }
  0x66   :  { %1988 = vmatprep.subr.bf16.mxu1 %v5705_v43  ;;  %v5799_v43 = vld [vmem:[#allocation5 + $0x854] ss:$48 sps:$4 sm:$0xff]  }
  0x68   :  { %1919 = vmatpush2.bf16.msra.mxu0 %v5706_v45  ;;  %v5797_v45 = vld [vmem:[#allocation5 + $0x850] ss:$48 sps:$4 sm:$0xff]  }
  0x69   :  { %1989 = vmatpush1.bf16.msra.mxu1 %v5703_v44  ;;  %1920 = vmatprep.subr.bf16.mxu0 %v5707_v46  ;;  %v5794_v44 = vld [vmem:[#allocation5 + $0x250] ss:$48 sps:$4 sm:$0xff]   ;;  %v5802_v46 = vld [vmem:[#allocation5 + $0x1f4] ss:$48 sps:$4 sm:$0xff]  }
  0x6a   :  { %1990 = vmatprep.subr.bf16.mxu1 %v5711_v47  ;;  %v5805_v47 = vld [vmem:[#allocation5 + $0x7f4] ss:$48 sps:$4 sm:$0xff]  }
  0x6c   :  { %1921 = vmatpush2.bf16.msra.mxu0 %v5712_v49  ;;  %v5803_v49 = vld [vmem:[#allocation5 + $0x7f0] ss:$48 sps:$4 sm:$0xff]  }
  0x6d   :  { %1991 = vmatpush1.bf16.msra.mxu1 %v5709_v48  ;;  %1922 = vmatprep.subr.bf16.mxu0 %v5713_v50  ;;  %v5800_v48 = vld [vmem:[#allocation5 + $0x1f0] ss:$48 sps:$4 sm:$0xff]   ;;  %v5808_v50 = vld [vmem:[#allocation5 + $0x194] ss:$48 sps:$4 sm:$0xff]  }
  0x6e   :  { %1992 = vmatprep.subr.bf16.mxu1 %v5717_v52  ;;  %v5811_v52 = vld [vmem:[#allocation5 + $0x794] ss:$48 sps:$4 sm:$0xff]  }
  0x70   :  { %1923 = vmatpush2.bf16.msra.mxu0 %v5718_v54  ;;  %v5809_v54 = vld [vmem:[#allocation5 + $0x790] ss:$48 sps:$4 sm:$0xff]  }
  0x71   :  { %1993 = vmatpush1.bf16.msra.mxu1 %v5715_v53  ;;  %1924 = vmatprep.subr.bf16.mxu0 %v5719_v55  ;;  %v5806_v53 = vld [vmem:[#allocation5 + $0x190] ss:$48 sps:$4 sm:$0xff]   ;;  %v5814_v55 = vld [vmem:[#allocation5 + $0x134] ss:$48 sps:$4 sm:$0xff]  }
  0x72   :  { %1994 = vmatprep.subr.bf16.mxu1 %v5723_v56  ;;  %v5817_v56 = vld [vmem:[#allocation5 + $0x734] ss:$48 sps:$4 sm:$0xff]  }
  0x74   :  { %1925 = vmatpush2.bf16.msra.mxu0 %v5724_v58  ;;  %v5815_v58 = vld [vmem:[#allocation5 + $0x730] ss:$48 sps:$4 sm:$0xff]  }
  0x75   :  { %1995 = vmatpush1.bf16.msra.mxu1 %v5721_v57  ;;  %1926 = vmatprep.subr.bf16.mxu0 %v5725_v59  ;;  %v5812_v57 = vld [vmem:[#allocation5 + $0x130] ss:$48 sps:$4 sm:$0xff]   ;;  %v5820_v59 = vld [vmem:[#allocation5 + $0xd4] ss:$48 sps:$4 sm:$0xff]  }
  0x76   :  { %1996 = vmatprep.subr.bf16.mxu1 %v5729_v60  ;;  %v5823_v60 = vld [vmem:[#allocation5 + $0x6d4] ss:$48 sps:$4 sm:$0xff]  }
  0x78   :  { %1927 = vmatpush2.bf16.msra.mxu0 %v5730_v62  ;;  %v5821_v62 = vld [vmem:[#allocation5 + $0x6d0] ss:$48 sps:$4 sm:$0xff]  }
  0x79   :  { %1997 = vmatpush1.bf16.msra.mxu1 %v5727_v61  ;;  %1928 = vmatprep.subr.bf16.mxu0 %v5731_v63  ;;  %v5818_v61 = vld [vmem:[#allocation5 + $0xd0] ss:$48 sps:$4 sm:$0xff]   ;;  %v5826_v63 = vld [vmem:[#allocation5 + $0x74] ss:$48 sps:$4 sm:$0xff]  }
  0x7a   :  { %1998 = vmatprep.subr.bf16.mxu1 %v5735_v1  ;;  %v5829_v1 = vld [vmem:[#allocation5 + $0x674] ss:$48 sps:$4 sm:$0xff]  }
  0x7c   :  { %1929 = vmatpush2.bf16.msra.mxu0 %v5736_v3  ;;  %v5827_v3 = vld [vmem:[#allocation5 + $0x670] ss:$48 sps:$4 sm:$0xff]  }
  0x7d   :  { %1999 = vmatpush1.bf16.msra.mxu1 %v5733_v2  ;;  %2027 = vmatprep.subr.bf16.mxu0 %v5745_v5  ;;  %v5824_v2 = vld [vmem:[#allocation5 + $0x70] ss:$48 sps:$4 sm:$0xff]   ;;  %v5835_v5 = vld [vmem:[#allocation5 + $0x614] ss:$48 sps:$4 sm:$0xff]  }
  0x7e   :  { %2000 = vmatprep.subr.bf16.mxu1 %v5742_v4  ;;  %v5832_v4 = vld [vmem:[#allocation5 + $0x14] ss:$48 sps:$4 sm:$0xff]  }
  0x7f   :  { %1931 = vmatmul.mubr.bf16.vlgmr.msra.gmra.mxu0 %v6658_v6 }
  0x80   :  { %2028 = vmatpush1.bf16.msra.mxu0 %v5743_v8  ;;  %2059 = vmatprep.mubr.bf16.mxu0 %v6601_v0  ;;  %v5833_v8 = vld [vmem:[#allocation5 + $0x610] ss:$48 sps:$4 sm:$0xff]  }
  0x81   :  { %2001 = vmatpush2.bf16.msra.mxu1 %v5740_v7  ;;  %2029 = vmatprep.subr.bf16.mxu0 %v5751_v10  ;;  %v5830_v7 = vld [vmem:[#allocation5 + $0x10] ss:$48 sps:$4 sm:$0xff]   ;;  %v5841_v10 = vld [vmem:[#allocation5 + $0x2bc] ss:$48 sps:$4 sm:$0xff]  }
  0x82   :  { %2002 = vmatprep.subr.bf16.mxu1 %v5748_v9  ;;  %v5838_v9 = vld [vmem:[#allocation5 + $0x5b4] ss:$48 sps:$4 sm:$0xff]  }
  0x84   :  { %2030 = vmatpush1.bf16.msra.mxu0 %v5749_v12  ;;  %v5839_v12 = vld [vmem:[#allocation5 + $0x2b8] ss:$48 sps:$4 sm:$0xff]  }
  0x85   :  { %2003 = vmatpush2.bf16.msra.mxu1 %v5746_v11  ;;  %2031 = vmatprep.subr.bf16.mxu0 %v5757_v14  ;;  %v5836_v11 = vld [vmem:[#allocation5 + $0x5b0] ss:$48 sps:$4 sm:$0xff]   ;;  %v5847_v14 = vld [vmem:[#allocation5 + $0x25c] ss:$48 sps:$4 sm:$0xff]  }
  0x86   :  { %2004 = vmatprep.subr.bf16.mxu1 %v5754_v13  ;;  %v5844_v13 = vld [vmem:[#allocation5 + $0x554] ss:$48 sps:$4 sm:$0xff]  }
  0x88   :  { %2032 = vmatpush1.bf16.msra.mxu0 %v5755_v16  ;;  %v5845_v16 = vld [vmem:[#allocation5 + $0x258] ss:$48 sps:$4 sm:$0xff]  }
  0x89   :  { %2005 = vmatpush2.bf16.msra.mxu1 %v5752_v15  ;;  %2033 = vmatprep.subr.bf16.mxu0 %v5763_v18  ;;  %v5842_v15 = vld [vmem:[#allocation5 + $0x550] ss:$48 sps:$4 sm:$0xff]   ;;  %v5853_v18 = vld [vmem:[#allocation5 + $0x1fc] ss:$48 sps:$4 sm:$0xff]  }
  0x8a   :  { %2006 = vmatprep.subr.bf16.mxu1 %v5760_v17  ;;  %v5850_v17 = vld [vmem:[#allocation5 + $0x4f4] ss:$48 sps:$4 sm:$0xff]  }
  0x8c   :  { %2034 = vmatpush1.bf16.msra.mxu0 %v5761_v20  ;;  %v5851_v20 = vld [vmem:[#allocation5 + $0x1f8] ss:$48 sps:$4 sm:$0xff]  }
  0x8d   :  { %2007 = vmatpush2.bf16.msra.mxu1 %v5758_v19  ;;  %2035 = vmatprep.subr.bf16.mxu0 %v5769_v22  ;;  %v5848_v19 = vld [vmem:[#allocation5 + $0x4f0] ss:$48 sps:$4 sm:$0xff]   ;;  %v5859_v22 = vld [vmem:[#allocation5 + $0x19c] ss:$48 sps:$4 sm:$0xff]  }
  0x8e   :  { %2008 = vmatprep.subr.bf16.mxu1 %v5766_v21  ;;  %v5856_v21 = vld [vmem:[#allocation5 + $0x494] ss:$48 sps:$4 sm:$0xff]  }
  0x90   :  { %2036 = vmatpush1.bf16.msra.mxu0 %v5767_v24  ;;  %v5862_v24 = vld [vmem:[#allocation5 + $0x434] ss:$48 sps:$4 sm:$0xff]  }
  0x91   :  { %2009 = vmatpush2.bf16.msra.mxu1 %v5764_v23  ;;  %2037 = vmatprep.subr.bf16.mxu0 %v5775_v26  ;;  %v5854_v23 = vld [vmem:[#allocation5 + $0x490] ss:$48 sps:$4 sm:$0xff]  }
  0x92   :  { %2010 = vmatprep.subr.bf16.mxu1 %v5772_v25  ;;  %v5865_v25 = vld [vmem:[#allocation5 + $0x13c] ss:$48 sps:$4 sm:$0xff]   ;;  %v5860_v26 = vld [vmem:[#allocation5 + $0x430] ss:$48 sps:$4 sm:$0xff]  }
  0x94   :  { %2038 = vmatpush1.bf16.msra.mxu0 %v5773_v28  ;;  %v5871_v28 = vld [vmem:[#allocation5 + $0xdc] ss:$48 sps:$4 sm:$0xff]  }
  0x95   :  { %2011 = vmatpush2.bf16.msra.mxu1 %v5770_v27  ;;  %2039 = vmatprep.subr.bf16.mxu0 %v5781_v30  ;;  %v5868_v27 = vld [vmem:[#allocation5 + $0x3d4] ss:$48 sps:$4 sm:$0xff]   ;;  %v5869_v30 = vld [vmem:[#allocation5 + $0xd8] ss:$48 sps:$4 sm:$0xff]  }
  0x96   :  { %2012 = vmatprep.subr.bf16.mxu1 %v5778_v29  ;;  %v5866_v29 = vld [vmem:[#allocation5 + $0x3d0] ss:$48 sps:$4 sm:$0xff]  }
  0x98   :  { %2040 = vmatpush1.bf16.msra.mxu0 %v5779_v32  ;;  %v5877_v32 = vld [vmem:[#allocation5 + $0x7c] ss:$48 sps:$4 sm:$0xff]  }
  0x99   :  { %2013 = vmatpush2.bf16.msra.mxu1 %v5776_v31  ;;  %2041 = vmatprep.subr.bf16.mxu0 %v5787_v34  ;;  %v5874_v31 = vld [vmem:[#allocation5 + $0x374] ss:$48 sps:$4 sm:$0xff]   ;;  %v5875_v34 = vld [vmem:[#allocation5 + $0x78] ss:$48 sps:$4 sm:$0xff]  }
  0x9a   :  { %2014 = vmatprep.subr.bf16.mxu1 %v5784_v33  ;;  %v5872_v33 = vld [vmem:[#allocation5 + $0x370] ss:$48 sps:$4 sm:$0xff]  }
  0x9c   :  { %2042 = vmatpush1.bf16.msra.mxu0 %v5785_v37  ;;  %v5883_v37 = vld [vmem:[#allocation5 + $0x1c] ss:$48 sps:$4 sm:$0xff]  }
  0x9d   :  { %2015 = vmatpush2.bf16.msra.mxu1 %v5782_v36  ;;  %2070 = vmatprep.subr.bf16.mxu0 %v5790_v38  ;;  %v5880_v36 = vld [vmem:[#allocation5 + $0x314] ss:$48 sps:$4 sm:$0xff]   ;;  %v5878_v38 = vld [vmem:[#allocation5 + $0x310] ss:$48 sps:$4 sm:$0xff]  }
  0x9e   :  { %2113 = vmatprep.subr.bf16.mxu1 %v5793_v39  ;;  %v5881_v39 = vld [vmem:[#allocation5 + $0x18] ss:$48 sps:$4 sm:$0xff]  }
  0x9f   :  { %2060 = vmatmul.mubr.bf16.vlgmr.msra.gmra.mxu0 %v6651_v35 }
  0xa0   :  { %2017 = vmatmul.mubr.bf16.vlgmr.msra.gmra.mxu1 %v6658_v6  ;;  %2071 = vmatpush1.bf16.msra.mxu0 %v5788_v40  ;;  %v5886_v40 = vld [vmem:[#allocation5 + $0x5bc] ss:$48 sps:$4 sm:$0xff]  }
  0xa1   :  { %2114 = vmatpush1.bf16.msra.mxu1 %v5791_v41  ;;  %2072 = vmatprep.subr.bf16.mxu0 %v5796_v42  ;;  %v5889_v41 = vld [vmem:[#allocation5 + $0x8bc] ss:$48 sps:$4 sm:$0xff]   ;;  %v5884_v42 = vld [vmem:[#allocation5 + $0x5b8] ss:$48 sps:$4 sm:$0xff]  }
  0xa2   :  { %2115 = vmatprep.subr.bf16.mxu1 %v5799_v43  ;;  %2145 = vmatprep.mubr.bf16.mxu1 %v6601_v0  ;;  %v5887_v43 = vld [vmem:[#allocation5 + $0x8b8] ss:$48 sps:$4 sm:$0xff]  }
  0xa3   :  { %2102 = vmatprep.mubr.bf16.mxu0 %v6654_v51 }
  0xa4   :  { %2073 = vmatpush1.bf16.msra.mxu0 %v5794_v44  ;;  %v5892_v44 = vld [vmem:[#allocation5 + $0x55c] ss:$48 sps:$4 sm:$0xff]  }
  0xa5   :  { %2116 = vmatpush1.bf16.msra.mxu1 %v5797_v45  ;;  %2074 = vmatprep.subr.bf16.mxu0 %v5802_v46  ;;  %v5895_v45 = vld [vmem:[#allocation5 + $0x85c] ss:$48 sps:$4 sm:$0xff]   ;;  %v5890_v46 = vld [vmem:[#allocation5 + $0x558] ss:$48 sps:$4 sm:$0xff]  }
  0xa6   :  { %2117 = vmatprep.subr.bf16.mxu1 %v5805_v47  ;;  %v5893_v47 = vld [vmem:[#allocation5 + $0x858] ss:$48 sps:$4 sm:$0xff]  }
  0xa8   :  { %2075 = vmatpush1.bf16.msra.mxu0 %v5800_v48  ;;  %v5898_v48 = vld [vmem:[#allocation5 + $0x4fc] ss:$48 sps:$4 sm:$0xff]  }
  0xa9   :  { %2118 = vmatpush1.bf16.msra.mxu1 %v5803_v49  ;;  %2076 = vmatprep.subr.bf16.mxu0 %v5808_v50  ;;  %v5901_v49 = vld [vmem:[#allocation5 + $0x7fc] ss:$48 sps:$4 sm:$0xff]   ;;  %v5896_v50 = vld [vmem:[#allocation5 + $0x4f8] ss:$48 sps:$4 sm:$0xff]  }
  0xaa   :  { %2119 = vmatprep.subr.bf16.mxu1 %v5811_v52  ;;  %v5899_v52 = vld [vmem:[#allocation5 + $0x7f8] ss:$48 sps:$4 sm:$0xff]  }
  0xac   :  { %2077 = vmatpush1.bf16.msra.mxu0 %v5806_v53  ;;  %v5904_v53 = vld [vmem:[#allocation5 + $0x49c] ss:$48 sps:$4 sm:$0xff]  }
  0xad   :  { %2120 = vmatpush1.bf16.msra.mxu1 %v5809_v54  ;;  %2078 = vmatprep.subr.bf16.mxu0 %v5814_v55  ;;  %v5907_v54 = vld [vmem:[#allocation5 + $0x79c] ss:$48 sps:$4 sm:$0xff]   ;;  %v5902_v55 = vld [vmem:[#allocation5 + $0x498] ss:$48 sps:$4 sm:$0xff]  }
  0xae   :  { %2121 = vmatprep.subr.bf16.mxu1 %v5817_v56  ;;  %v5905_v56 = vld [vmem:[#allocation5 + $0x798] ss:$48 sps:$4 sm:$0xff]  }
  0xb0   :  { %2079 = vmatpush1.bf16.msra.mxu0 %v5812_v57  ;;  %v5910_v57 = vld [vmem:[#allocation5 + $0x43c] ss:$48 sps:$4 sm:$0xff]  }
  0xb1   :  { %2122 = vmatpush1.bf16.msra.mxu1 %v5815_v58  ;;  %2080 = vmatprep.subr.bf16.mxu0 %v5820_v59  ;;  %v5913_v58 = vld [vmem:[#allocation5 + $0x73c] ss:$48 sps:$4 sm:$0xff]   ;;  %v5908_v59 = vld [vmem:[#allocation5 + $0x438] ss:$48 sps:$4 sm:$0xff]  }
  0xb2   :  { %2123 = vmatprep.subr.bf16.mxu1 %v5823_v60  ;;  %v5911_v60 = vld [vmem:[#allocation5 + $0x738] ss:$48 sps:$4 sm:$0xff]  }
  0xb4   :  { %2081 = vmatpush1.bf16.msra.mxu0 %v5818_v61  ;;  %v5916_v61 = vld [vmem:[#allocation5 + $0x3dc] ss:$48 sps:$4 sm:$0xff]  }
  0xb5   :  { %2124 = vmatpush1.bf16.msra.mxu1 %v5821_v62  ;;  %2082 = vmatprep.subr.bf16.mxu0 %v5826_v63  ;;  %v5919_v62 = vld [vmem:[#allocation5 + $0x6dc] ss:$48 sps:$4 sm:$0xff]   ;;  %v5914_v63 = vld [vmem:[#allocation5 + $0x3d8] ss:$48 sps:$4 sm:$0xff]  }
  0xb6   :  { %2125 = vmatprep.subr.bf16.mxu1 %v5829_v1  ;;  %v5917_v1 = vld [vmem:[#allocation5 + $0x6d8] ss:$48 sps:$4 sm:$0xff]  }
  0xb8   :  { %2083 = vmatpush1.bf16.msra.mxu0 %v5824_v2  ;;  %v5922_v2 = vld [vmem:[#allocation5 + $0x37c] ss:$48 sps:$4 sm:$0xff]  }
  0xb9   :  { %2126 = vmatpush1.bf16.msra.mxu1 %v5827_v3  ;;  %2084 = vmatprep.subr.bf16.mxu0 %v5832_v4  ;;  %v5925_v3 = vld [vmem:[#allocation5 + $0x67c] ss:$48 sps:$4 sm:$0xff]   ;;  %v5920_v4 = vld [vmem:[#allocation5 + $0x378] ss:$48 sps:$4 sm:$0xff]  }
  0xba   :  { %2127 = vmatprep.subr.bf16.mxu1 %v5835_v5  ;;  %v5923_v5 = vld [vmem:[#allocation5 + $0x678] ss:$48 sps:$4 sm:$0xff]  }
  0xbc   :  { %2085 = vmatpush1.bf16.msra.mxu0 %v5830_v7  ;;  %v5928_v7 = vld [vmem:[#allocation5 + $0x31c] ss:$48 sps:$4 sm:$0xff]  }
  0xbd   :  { %2128 = vmatpush1.bf16.msra.mxu1 %v5833_v8  ;;  %2086 = vmatprep.subr.bf16.mxu0 %v5838_v9  ;;  %v5931_v8 = vld [vmem:[#allocation5 + $0x61c] ss:$48 sps:$4 sm:$0xff]   ;;  %v5926_v9 = vld [vmem:[#allocation5 + $0x318] ss:$48 sps:$4 sm:$0xff]  }
  0xbe   :  { %2156 = vmatprep.subr.bf16.mxu1 %v5841_v10  ;;  %v5929_v10 = vld [vmem:[#allocation5 + $0x618] ss:$48 sps:$4 sm:$0xff]  }
  0xc0   :  { %2146 = vmatmul.mubr.bf16.vlgmr.msra.gmra.mxu1 %v6651_v35  ;;  %2087 = vmatpush2.bf16.msra.mxu0 %v5836_v11  ;;  %v5857_v35 = vld [vmem:[#allocation5 + $0x198] ss:$48 sps:$4 sm:$0xff]   ;;  %v5934_v11 = vld [vmem:[#allocation5 + $0x2c4] ss:$48 sps:$4 sm:$0xff]  }
  0xc1   :  { %2157 = vmatpush1.bf16.msra.mxu1 %v5839_v12  ;;  %2088 = vmatprep.subr.bf16.mxu0 %v5844_v13  ;;  %v5937_v12 = vld [vmem:[#allocation5 + $0x8c4] ss:$48 sps:$4 sm:$0xff]   ;;  %v5932_v13 = vld [vmem:[#allocation5 + $0x2c0] ss:$48 sps:$4 sm:$0xff]  }
  0xc2   :  { %2158 = vmatprep.subr.bf16.mxu1 %v5847_v14  ;;  %2188 = vmatprep.mubr.bf16.mxu1 %v6654_v51  ;;  %v5863_v51 = vld [vmem:[#allocation5 + $0x138] ss:$48 sps:$4 sm:$0xff]   ;;  %v5935_v14 = vld [vmem:[#allocation5 + $0x8c0] ss:$48 sps:$4 sm:$0xff]  }
  0xc4   :  { %2089 = vmatpush2.bf16.msra.mxu0 %v5842_v15  ;;  %v5940_v15 = vld [vmem:[#allocation5 + $0x264] ss:$48 sps:$4 sm:$0xff]  }
  0xc5   :  { %2159 = vmatpush1.bf16.msra.mxu1 %v5845_v16  ;;  %2090 = vmatprep.subr.bf16.mxu0 %v5850_v17  ;;  %v5943_v16 = vld [vmem:[#allocation5 + $0x864] ss:$48 sps:$4 sm:$0xff]   ;;  %v6671_v17 = vld [vmem:[#allocation2 + $0x8] ss:$12 sps:$4 sm:$0xff]  }
  0xc6   :  { %2160 = vmatprep.subr.bf16.mxu1 %v5853_v18  ;;  %v5938_v18 = vld [vmem:[#allocation5 + $0x260] ss:$48 sps:$4 sm:$0xff]  }
  0xc8   :  { %2091 = vmatpush2.bf16.msra.mxu0 %v5848_v19  ;;  %v5941_v19 = vld [vmem:[#allocation5 + $0x860] ss:$48 sps:$4 sm:$0xff]  }
  0xc9   :  { %2161 = vmatpush1.bf16.msra.mxu1 %v5851_v20  ;;  %2092 = vmatprep.subr.bf16.mxu0 %v5856_v21  ;;  %v5946_v20 = vld [vmem:[#allocation5 + $0x204] ss:$48 sps:$4 sm:$0xff]  }
  0xca   :  { %2162 = vmatprep.subr.bf16.mxu1 %v5859_v22  ;;  %v5949_v21 = vld [vmem:[#allocation5 + $0x804] ss:$48 sps:$4 sm:$0xff]   ;;  %v6675_v22 = vld [vmem:[#allocation2 + $0x4] ss:$12 sps:$4 sm:$0xff]  }
  0xcc   :  { %2093 = vmatpush2.bf16.msra.mxu0 %v5854_v23  ;;  %v5944_v23 = vld [vmem:[#allocation5 + $0x200] ss:$48 sps:$4 sm:$0xff]  }
  0xcd   :  { %2163 = vmatpush1.bf16.msra.mxu1 %v5857_v35  ;;  %2094 = vmatprep.subr.bf16.mxu0 %v5862_v24  ;;  %v5952_v35 = vld [vmem:[#allocation5 + $0x1a4] ss:$48 sps:$4 sm:$0xff]  }
  0xce   :  { %2164 = vmatprep.subr.bf16.mxu1 %v5865_v25  ;;  %v5955_v24 = vld [vmem:[#allocation5 + $0x7a4] ss:$48 sps:$4 sm:$0xff]   ;;  %v5950_v25 = vld [vmem:[#allocation5 + $0x1a0] ss:$48 sps:$4 sm:$0xff]  }
  0xd0   :  { %2095 = vmatpush2.bf16.msra.mxu0 %v5860_v26  ;;  %v5953_v26 = vld [vmem:[#allocation5 + $0x7a0] ss:$48 sps:$4 sm:$0xff]  }
  0xd1   :  { %2165 = vmatpush1.bf16.msra.mxu1 %v5863_v51  ;;  %2096 = vmatprep.subr.bf16.mxu0 %v5868_v27  ;;  %v5958_v51 = vld [vmem:[#allocation5 + $0x144] ss:$48 sps:$4 sm:$0xff]  }
  0xd2   :  { %2166 = vmatprep.subr.bf16.mxu1 %v5871_v28  ;;  %v5961_v27 = vld [vmem:[#allocation5 + $0x744] ss:$48 sps:$4 sm:$0xff]   ;;  %v5956_v28 = vld [vmem:[#allocation5 + $0x140] ss:$48 sps:$4 sm:$0xff]  }
  0xd4   :  { %2097 = vmatpush2.bf16.msra.mxu0 %v5866_v29  ;;  %v5959_v29 = vld [vmem:[#allocation5 + $0x740] ss:$48 sps:$4 sm:$0xff]  }
  0xd5   :  { %2167 = vmatpush1.bf16.msra.mxu1 %v5869_v30  ;;  %2098 = vmatprep.subr.bf16.mxu0 %v5874_v31  ;;  %v5964_v30 = vld [vmem:[#allocation5 + $0xe4] ss:$48 sps:$4 sm:$0xff]  }
  0xd6   :  { %2168 = vmatprep.subr.bf16.mxu1 %v5877_v32  ;;  %v5967_v31 = vld [vmem:[#allocation5 + $0x6e4] ss:$48 sps:$4 sm:$0xff]   ;;  %v5962_v32 = vld [vmem:[#allocation5 + $0xe0] ss:$48 sps:$4 sm:$0xff]  }
  0xd8   :  { %2099 = vmatpush2.bf16.msra.mxu0 %v5872_v33  ;;  %v5965_v33 = vld [vmem:[#allocation5 + $0x6e0] ss:$48 sps:$4 sm:$0xff]  }
  0xd9   :  { %2169 = vmatpush1.bf16.msra.mxu1 %v5875_v34  ;;  %2100 = vmatprep.subr.bf16.mxu0 %v5880_v36  ;;  %v5970_v34 = vld [vmem:[#allocation5 + $0x84] ss:$48 sps:$4 sm:$0xff]  }
  0xda   :  { %2170 = vmatprep.subr.bf16.mxu1 %v5883_v37  ;;  %v5973_v36 = vld [vmem:[#allocation5 + $0x684] ss:$48 sps:$4 sm:$0xff]   ;;  %v5968_v37 = vld [vmem:[#allocation5 + $0x80] ss:$48 sps:$4 sm:$0xff]  }
  0xdc   :  { %2101 = vmatpush2.bf16.msra.mxu0 %v5878_v38  ;;  %v5971_v38 = vld [vmem:[#allocation5 + $0x680] ss:$48 sps:$4 sm:$0xff]  }
  0xdd   :  { %2171 = vmatpush1.bf16.msra.mxu1 %v5881_v39  ;;  %2199 = vmatprep.subr.bf16.mxu0 %v5889_v41  ;;  %v5976_v39 = vld [vmem:[#allocation5 + $0x24] ss:$48 sps:$4 sm:$0xff]   ;;  %v5974_v41 = vld [vmem:[#allocation5 + $0x20] ss:$48 sps:$4 sm:$0xff]  }
  0xde   :  { %2172 = vmatprep.subr.bf16.mxu1 %v5886_v40  ;;  %v5979_v40 = vld [vmem:[#allocation5 + $0x624] ss:$48 sps:$4 sm:$0xff]  }
  0xdf   :  { %2103 = vmatmul.mubr.bf16.vlgmr.msra.gmra.mxu0 %v6658_v6 }
  0xe0   :  { %2200 = vmatpush1.bf16.msra.mxu0 %v5887_v43  ;;  %2231 = vmatprep.mubr.bf16.mxu0 %v6601_v0  ;;  %v5982_v43 = vld [vmem:[#allocation5 + $0x5c4] ss:$48 sps:$4 sm:$0xff]  }
  0xe1   :  { %2173 = vmatpush2.bf16.msra.mxu1 %v5884_v42  ;;  %2201 = vmatprep.subr.bf16.mxu0 %v5895_v45  ;;  %v5977_v42 = vld [vmem:[#allocation5 + $0x620] ss:$48 sps:$4 sm:$0xff]  }
  0xe2   :  { %2174 = vmatprep.subr.bf16.mxu1 %v5892_v44  ;;  %v5985_v44 = vld [vmem:[#allocation5 + $0x2cc] ss:$48 sps:$4 sm:$0xff]   ;;  %v5980_v45 = vld [vmem:[#allocation5 + $0x5c0] ss:$48 sps:$4 sm:$0xff]  }
  0xe4   :  { %2202 = vmatpush1.bf16.msra.mxu0 %v5893_v47  ;;  %v5988_v47 = vld [vmem:[#allocation5 + $0x564] ss:$48 sps:$4 sm:$0xff]  }
  0xe5   :  { %2175 = vmatpush2.bf16.msra.mxu1 %v5890_v46  ;;  %2203 = vmatprep.subr.bf16.mxu0 %v5901_v49  ;;  %v5983_v46 = vld [vmem:[#allocation5 + $0x2c8] ss:$48 sps:$4 sm:$0xff]   ;;  %v5986_v49 = vld [vmem:[#allocation5 + $0x560] ss:$48 sps:$4 sm:$0xff]  }
  0xe6   :  { %2176 = vmatprep.subr.bf16.mxu1 %v5898_v48  ;;  %v5991_v48 = vld [vmem:[#allocation5 + $0x26c] ss:$48 sps:$4 sm:$0xff]  }
  0xe8   :  { %2204 = vmatpush1.bf16.msra.mxu0 %v5899_v52  ;;  %v5994_v52 = vld [vmem:[#allocation5 + $0x504] ss:$48 sps:$4 sm:$0xff]  }
  0xe9   :  { %2177 = vmatpush2.bf16.msra.mxu1 %v5896_v50  ;;  %2205 = vmatprep.subr.bf16.mxu0 %v5907_v54  ;;  %v5989_v50 = vld [vmem:[#allocation5 + $0x268] ss:$48 sps:$4 sm:$0xff]   ;;  %v5992_v54 = vld [vmem:[#allocation5 + $0x500] ss:$48 sps:$4 sm:$0xff]  }
  0xea   :  { %2178 = vmatprep.subr.bf16.mxu1 %v5904_v53  ;;  %v5997_v53 = vld [vmem:[#allocation5 + $0x20c] ss:$48 sps:$4 sm:$0xff]  }
  0xec   :  { %2206 = vmatpush1.bf16.msra.mxu0 %v5905_v56  ;;  %v6000_v56 = vld [vmem:[#allocation5 + $0x4a4] ss:$48 sps:$4 sm:$0xff]  }
  0xed   :  { %2179 = vmatpush2.bf16.msra.mxu1 %v5902_v55  ;;  %2207 = vmatprep.subr.bf16.mxu0 %v5913_v58  ;;  %v5995_v55 = vld [vmem:[#allocation5 + $0x208] ss:$48 sps:$4 sm:$0xff]   ;;  %v5998_v58 = vld [vmem:[#allocation5 + $0x4a0] ss:$48 sps:$4 sm:$0xff]  }
  0xee   :  { %2180 = vmatprep.subr.bf16.mxu1 %v5910_v57  ;;  %v6003_v57 = vld [vmem:[#allocation5 + $0x1ac] ss:$48 sps:$4 sm:$0xff]  }
  0xf0   :  { %2208 = vmatpush1.bf16.msra.mxu0 %v5911_v60  ;;  %v6006_v60 = vld [vmem:[#allocation5 + $0x444] ss:$48 sps:$4 sm:$0xff]  }
  0xf1   :  { %2181 = vmatpush2.bf16.msra.mxu1 %v5908_v59  ;;  %2209 = vmatprep.subr.bf16.mxu0 %v5919_v62  ;;  %v6001_v59 = vld [vmem:[#allocation5 + $0x1a8] ss:$48 sps:$4 sm:$0xff]   ;;  %v6004_v62 = vld [vmem:[#allocation5 + $0x440] ss:$48 sps:$4 sm:$0xff]  }
  0xf2   :  { %2182 = vmatprep.subr.bf16.mxu1 %v5916_v61  ;;  %v6009_v61 = vld [vmem:[#allocation5 + $0x14c] ss:$48 sps:$4 sm:$0xff]  }
  0xf4   :  { %2210 = vmatpush1.bf16.msra.mxu0 %v5917_v1  ;;  %v6012_v1 = vld [vmem:[#allocation5 + $0x3e4] ss:$48 sps:$4 sm:$0xff]  }
  0xf5   :  { %2183 = vmatpush2.bf16.msra.mxu1 %v5914_v63  ;;  %2211 = vmatprep.subr.bf16.mxu0 %v5925_v3  ;;  %v6007_v63 = vld [vmem:[#allocation5 + $0x148] ss:$48 sps:$4 sm:$0xff]   ;;  %v6010_v3 = vld [vmem:[#allocation5 + $0x3e0] ss:$48 sps:$4 sm:$0xff]  }
  0xf6   :  { %2184 = vmatprep.subr.bf16.mxu1 %v5922_v2  ;;  %v6015_v2 = vld [vmem:[#allocation5 + $0xec] ss:$48 sps:$4 sm:$0xff]  }
  0xf8   :  { %2212 = vmatpush1.bf16.msra.mxu0 %v5923_v5  ;;  %v6018_v5 = vld [vmem:[#allocation5 + $0x384] ss:$48 sps:$4 sm:$0xff]  }
  0xf9   :  { %2185 = vmatpush2.bf16.msra.mxu1 %v5920_v4  ;;  %2213 = vmatprep.subr.bf16.mxu0 %v5931_v8  ;;  %v6013_v4 = vld [vmem:[#allocation5 + $0xe8] ss:$48 sps:$4 sm:$0xff]   ;;  %v6021_v8 = vld [vmem:[#allocation5 + $0x8c] ss:$48 sps:$4 sm:$0xff]  }
  0xfa   :  { %2186 = vmatprep.subr.bf16.mxu1 %v5928_v7  ;;  %v382_v7 = vlaneseq }
  0xfc   :  { %2214 = vmatpush1.bf16.msra.mxu0 %v5929_v10  ;;  %v6019_v10 = vld [vmem:[#allocation5 + $0x88] ss:$48 sps:$4 sm:$0xff]  }
  0xfd   :  { %2187 = vmatpush2.bf16.msra.mxu1 %v5926_v9  ;;  %2242 = vmatprep.subr.bf16.mxu0 %v5934_v11  ;;  %v6016_v9 = vld [vmem:[#allocation5 + $0x380] ss:$48 sps:$4 sm:$0xff]   ;;  %v6024_v11 = vld [vmem:[#allocation5 + $0x324] ss:$48 sps:$4 sm:$0xff]  }
  0xfe   :  { %2285 = vmatprep.subr.bf16.mxu1 %v5937_v12  ;;  %v6680_v12 = vshrl.u32 %v382_v7, 7  ;;  %v6070_v7 = vld [vmem:[#allocation5 + $0x328] ss:$48 sps:$4 sm:$0xff]  }
  0xff   :  { %2232 = vmatmul.mubr.bf16.vlgmr.msra.gmra.mxu0 %v6671_v17 }
 0x100   :  { %2189 = vmatmul.mubr.bf16.vlgmr.msra.gmra.mxu1 %v6658_v6  ;;  %2243 = vmatpush1.bf16.msra.mxu0 %v5932_v13  ;;  %v5947_v6 = vld [vmem:[#allocation5 + $0x800] ss:$48 sps:$4 sm:$0xff]   ;;  %v6027_v13 = vld [vmem:[#allocation5 + $0x2c] ss:$48 sps:$4 sm:$0xff]  }
 0x101   :  { %2286 = vmatpush1.bf16.msra.mxu1 %v5935_v14  ;;  %2244 = vmatprep.subr.bf16.mxu0 %v5940_v15  ;;  %v6022_v14 = vld [vmem:[#allocation5 + $0x320] ss:$48 sps:$4 sm:$0xff]   ;;  %v6025_v15 = vld [vmem:[#allocation5 + $0x28] ss:$48 sps:$4 sm:$0xff]  }
 0x102   :  { %2287 = vmatprep.subr.bf16.mxu1 %v5943_v16  ;;  %2317 = vmatprep.mubr.bf16.mxu1 %v6601_v0  ;;  %v6682_v16 = vld [vmem:[#allocation7] sm:$0xff] }
 0x103   :  { %2274 = vmatprep.mubr.bf16.mxu0 %v6675_v22 }
 0x104   :  { %2245 = vmatpush1.bf16.msra.mxu0 %v5938_v18  ;;  %v6685_v18 = vsub.s32 0, %v6680_v12 }
 0x105   :  { %2288 = vmatpush1.bf16.msra.mxu1 %v5941_v19  ;;  %2246 = vmatprep.subr.bf16.mxu0 %v5946_v20  ;;  %v6030_v19 = vld [vmem:[#allocation5 + $0x5cc] ss:$48 sps:$4 sm:$0xff]  }
 0x106   :  { %2289 = vmatprep.subr.bf16.mxu1 %v5949_v21  ;;  %v6033_v20 = vld [vmem:[#allocation5 + $0x8cc] ss:$48 sps:$4 sm:$0xff]   ;;  %v6028_v21 = vld [vmem:[#allocation5 + $0x5c8] ss:$48 sps:$4 sm:$0xff]  }
 0x108   :  { %2247 = vmatpush1.bf16.msra.mxu0 %v5944_v23  ;;  %v385_v23 = vrot.slane %v6682_v16, %v6685_v18 }
 0x109   :  { %2290 = vmatpush1.bf16.msra.mxu1 %v5947_v6  ;;  %2248 = vmatprep.subr.bf16.mxu0 %v5952_v35  ;;  %v6036_v6 = vld [vmem:[#allocation5 + $0x56c] ss:$48 sps:$4 sm:$0xff]  }
 0x10a   :  { %2291 = vmatprep.subr.bf16.mxu1 %v5955_v24  ;;  %v6039_v24 = vld [vmem:[#allocation5 + $0x86c] ss:$48 sps:$4 sm:$0xff]  }
 0x10c   :  { %2249 = vmatpush1.bf16.msra.mxu0 %v5950_v25 }
 0x10d   :  { %2292 = vmatpush1.bf16.msra.mxu1 %v5953_v26  ;;  %2250 = vmatprep.subr.bf16.mxu0 %v5958_v51  ;;  %v6689_v26 = vld [vmem:[#allocation2] ss:$12 sps:$4 sm:$0xff]  }
 0x10e   :  { %2293 = vmatprep.subr.bf16.mxu1 %v5961_v27  ;;  %v6034_v51 = vld [vmem:[#allocation5 + $0x568] ss:$48 sps:$4 sm:$0xff]  }
 0x10f   :  { %v6037_v27 = vld [vmem:[#allocation5 + $0x868] ss:$48 sps:$4 sm:$0xff]  }
 0x110   :  { %2251 = vmatpush1.bf16.msra.mxu0 %v5956_v28 }
 0x111   :  { %2294 = vmatpush1.bf16.msra.mxu1 %v5959_v29  ;;  %2252 = vmatprep.subr.bf16.mxu0 %v5964_v30  ;;  %v6042_v29 = vld [vmem:[#allocation5 + $0x50c] ss:$48 sps:$4 sm:$0xff]  }
 0x112   :  { %2295 = vmatprep.subr.bf16.mxu1 %v5967_v31 }
 0x114   :  { %2253 = vmatpush1.bf16.msra.mxu0 %v5962_v32  ;;  %v6045_v32 = vld [vmem:[#allocation5 + $0x80c] ss:$48 sps:$4 sm:$0xff]  }
 0x115   :  { %2296 = vmatpush1.bf16.msra.mxu1 %v5965_v33  ;;  %2254 = vmatprep.subr.bf16.mxu0 %v5970_v34  ;;  %v6040_v34 = vld [vmem:[#allocation5 + $0x508] ss:$48 sps:$4 sm:$0xff]  }
 0x116   :  { %2297 = vmatprep.subr.bf16.mxu1 %v5973_v36 }
 0x118   :  { %2255 = vmatpush1.bf16.msra.mxu0 %v5968_v37  ;;  %v6043_v37 = vld [vmem:[#allocation5 + $0x808] ss:$48 sps:$4 sm:$0xff]  }
 0x119   :  { %2298 = vmatpush1.bf16.msra.mxu1 %v5971_v38  ;;  %2256 = vmatprep.subr.bf16.mxu0 %v5976_v39  ;;  %v6048_v38 = vld [vmem:[#allocation5 + $0x4ac] ss:$48 sps:$4 sm:$0xff]  }
 0x11a   :  { %2299 = vmatprep.subr.bf16.mxu1 %v5979_v40  ;;  %v6051_v39 = vld [vmem:[#allocation5 + $0x7ac] ss:$48 sps:$4 sm:$0xff]  }
 0x11c   :  { %2257 = vmatpush1.bf16.msra.mxu0 %v5974_v41 }
 0x11d   :  { %2300 = vmatpush1.bf16.msra.mxu1 %v5977_v42  ;;  %2258 = vmatprep.subr.bf16.mxu0 %v5982_v43  ;;  %v6046_v43 = vld [vmem:[#allocation5 + $0x4a8] ss:$48 sps:$4 sm:$0xff]  }
 0x11e   :  { %2328 = vmatprep.subr.bf16.mxu1 %v5985_v44  ;;  %v6049_v44 = vld [vmem:[#allocation5 + $0x7a8] ss:$48 sps:$4 sm:$0xff]  }
 0x120   :  { %2318 = vmatmul.mubr.bf16.vlgmr.msra.gmra.mxu1 %v6671_v17  ;;  %2259 = vmatpush2.bf16.msra.mxu0 %v5980_v45  ;;  %v1975_v35 = vpop.f32.mrf.mxu1  ;;  %v6054_v45 = vld [vmem:[#allocation5 + $0x44c] ss:$48 sps:$4 sm:$0xff]  }
 0x121   :  { %2329 = vmatpush1.bf16.msra.mxu1 %v5983_v46  ;;  %2260 = vmatprep.subr.bf16.mxu0 %v5988_v47  ;;  %v6057_v46 = vld [vmem:[#allocation5 + $0x74c] ss:$48 sps:$4 sm:$0xff]  }
 0x122   :  { %2330 = vmatprep.subr.bf16.mxu1 %v5991_v48  ;;  %2360 = vmatprep.mubr.bf16.mxu1 %v6675_v22  ;;  %v6031_v22 = vld [vmem:[#allocation5 + $0x8c8] ss:$48 sps:$4 sm:$0xff]   ;;  %v6692_v30 = vpop.f32.mrf.mxu1 }
 0x124   :  { %2261 = vmatpush2.bf16.msra.mxu0 %v5986_v49  ;;  %v1979_v41 = vpop.f32.mrf.mxu1  ;;  %v6052_v49 = vld [vmem:[#allocation5 + $0x448] ss:$48 sps:$4 sm:$0xff]  }
 0x125   :  { %2331 = vmatpush1.bf16.msra.mxu1 %v5989_v50  ;;  %2262 = vmatprep.subr.bf16.mxu0 %v5994_v52  ;;  %v6055_v50 = vld [vmem:[#allocation5 + $0x748] ss:$48 sps:$4 sm:$0xff]   ;;  %v6060_v52 = vld [vmem:[#allocation5 + $0x3ec] ss:$48 sps:$4 sm:$0xff]  }
 0x126   :  { %2332 = vmatprep.subr.bf16.mxu1 %v5997_v53  ;;  %v6063_v53 = vld [vmem:[#allocation5 + $0x6ec] ss:$48 sps:$4 sm:$0xff]  }
 0x128   :  { %2263 = vmatpush2.bf16.msra.mxu0 %v5992_v54  ;;  %v6698_v54 = vsub.s32 1, %v6680_v12 }
 0x129   :  { %2333 = vmatpush1.bf16.msra.mxu1 %v5995_v55  ;;  %2264 = vmatprep.subr.bf16.mxu0 %v6000_v56  ;;  %v6058_v55 = vld [vmem:[#allocation5 + $0x3e8] ss:$48 sps:$4 sm:$0xff]  }
 0x12a   :  { %2334 = vmatprep.subr.bf16.mxu1 %v6003_v57  ;;  %v6061_v57 = vld [vmem:[#allocation5 + $0x6e8] ss:$48 sps:$4 sm:$0xff]  }
 0x12c   :  { %2265 = vmatpush2.bf16.msra.mxu0 %v5998_v58  ;;  %v389_v58 = vrot.slane %v6682_v16, %v6698_v54 }
 0x12d   :  { %2335 = vmatpush1.bf16.msra.mxu1 %v6001_v59  ;;  %2266 = vmatprep.subr.bf16.mxu0 %v6006_v60  ;;  %v6066_v59 = vld [vmem:[#allocation5 + $0x38c] ss:$48 sps:$4 sm:$0xff]  }
 0x12e   :  { %2336 = vmatprep.subr.bf16.mxu1 %v6009_v61  ;;  %v6069_v60 = vld [vmem:[#allocation5 + $0x68c] ss:$48 sps:$4 sm:$0xff]  }
 0x130   :  { %2267 = vmatpush2.bf16.msra.mxu0 %v6004_v62  ;;  %v6064_v62 = vld [vmem:[#allocation5 + $0x388] ss:$48 sps:$4 sm:$0xff]  }
 0x131   :  { %2337 = vmatpush1.bf16.msra.mxu1 %v6007_v63  ;;  %2268 = vmatprep.subr.bf16.mxu0 %v6012_v1  ;;  %v6067_v63 = vld [vmem:[#allocation5 + $0x688] ss:$48 sps:$4 sm:$0xff]  }
 0x132   :  { %2338 = vmatprep.subr.bf16.mxu1 %v6015_v2  ;;  %v1981_v2 = vpop.f32.mrf.mxu1 }
 0x134   :  { %2269 = vmatpush2.bf16.msra.mxu0 %v6010_v3  ;;  %v6072_v3 = vld [vmem:[#allocation5 + $0x32c] ss:$48 sps:$4 sm:$0xff]  }
 0x135   :  { %2339 = vmatpush1.bf16.msra.mxu1 %v6013_v4  ;;  %2270 = vmatprep.subr.bf16.mxu0 %v6018_v5  ;;  %v6075_v4 = vld [vmem:[#allocation5 + $0x62c] ss:$48 sps:$4 sm:$0xff]  }
 0x136   :  { %2340 = vmatprep.subr.bf16.mxu1 %v6021_v8  ;;  %v6073_v8 = vld [vmem:[#allocation5 + $0x628] ss:$48 sps:$4 sm:$0xff]  }
 0x138   :  { %2271 = vmatpush2.bf16.msra.mxu0 %v6016_v9 }
 0x139   :  { %2341 = vmatpush1.bf16.msra.mxu1 %v6019_v10  ;;  %2272 = vmatprep.subr.bf16.mxu0 %v6024_v11  ;;  %v6078_v10 = vld [vmem:[#allocation8 + $0xac] ss:$12 sps:$4 sm:$0xff]  }
 0x13a   :  { %2342 = vmatprep.subr.bf16.mxu1 %v6027_v13  ;;  %v6081_v11 = vld [vmem:[#allocation8 + $0x22c] ss:$12 sps:$4 sm:$0xff]  }
 0x13c   :  { %2273 = vmatpush2.bf16.msra.mxu0 %v6022_v14  ;;  %v6076_v14 = vld [vmem:[#allocation8 + $0xa8] ss:$12 sps:$4 sm:$0xff]  }
 0x13d   :  { %2343 = vmatpush1.bf16.msra.mxu1 %v6025_v15  ;;  %2371 = vmatprep.subr.bf16.mxu0 %v6033_v20  ;;  %v396_v15 = vsub.s32 3, %v6680_v12  ;;  %v6084_v20 = vld [vmem:[#allocation8 + $0x94] ss:$12 sps:$4 sm:$0xff]  }
 0x13e   :  { %2344 = vmatprep.subr.bf16.mxu1 %v6030_v19  ;;  %v6079_v19 = vld [vmem:[#allocation8 + $0x228] ss:$12 sps:$4 sm:$0xff]  }
 0x13f   :  { %v1932_v25 = vpop.f32.mrf.mxu0  ;;  %2275 = vmatmul.mubr.bf16.vlgmr.msra.gmra.mxu0 %v6689_v26 }
 0x140   :  { %v1933_v28 = vadd.f32 %v1932_v25, %v385_v23  ;;  %2372 = vmatpush1.bf16.msra.mxu0 %v6031_v22  ;;  %2403 = vmatprep.mubr.bf16.mxu0 %v6601_v0 }
 0x141   :  { %2345 = vmatpush2.bf16.msra.mxu1 %v6028_v21  ;;  %v1934_v31 = vpop.f32.mrf.mxu0  ;;  %2373 = vmatprep.subr.bf16.mxu0 %v6039_v24 }
 0x142   :  { %2346 = vmatprep.subr.bf16.mxu1 %v6036_v6  ;;  %v1976_v33 = vadd.f32 %v1975_v35, %v1933_v28  ;;  %v1935_v1 = vadd.f32 %v1934_v31, %v389_v58  ;;  %v6082_v6 = vld [vmem:[#allocation8 + $0x90] ss:$12 sps:$4 sm:$0xff]   ;;  %v6087_v35 = vld [vmem:[#allocation8 + $0x214] ss:$12 sps:$4 sm:$0xff]   ;;  %v6088_v31 = vld [vmem:[#allocation8 + $0x78] ss:$12 sps:$4 sm:$0xff]  }
 0x143   :  { %v1936_v36 = vpop.f32.mrf.mxu0 }
 0x144   :  { %v1937_v40 = vadd.f32 %v1936_v36, %v385_v23  ;;  %2374 = vmatpush1.bf16.msra.mxu0 %v6037_v27  ;;  %v2414_v47 = vmax.f32 %v1976_v33, 0.0  ;;  %v1978_v9 = vadd.f32 %v6692_v30, %v1935_v1  ;;  %v397_v23 = vrot.slane %v6682_v16, %v396_v15  ;;  %v6090_v27 = vld [vmem:[#allocation8 + $0x7c] ss:$12 sps:$4 sm:$0xff]   ;;  %v6121_v1 = vld [vmem:[#allocation8 + $0x180] ss:$12 sps:$4 sm:$0xff]  }
 0x145   :  { %2347 = vmatpush2.bf16.msra.mxu1 %v6034_v51  ;;  %2375 = vmatprep.subr.bf16.mxu0 %v6045_v32  ;;  %v1938_v56 = vpop.f32.mrf.mxu0  ;;  %v6085_v51 = vld [vmem:[#allocation8 + $0x210] ss:$12 sps:$4 sm:$0xff]  }
 0x146   :  { %2348 = vmatprep.subr.bf16.mxu1 %v6042_v29  ;;  %v1980_v42 = vadd.f32 %v1979_v41, %v1937_v40  ;;  %v1939_v61 = vadd.f32 %v1938_v56, %v389_v58  ;;  %v2415_v21 = vmax.f32 %v1978_v9, 0.0  ;;  %v6093_v32 = vld [vmem:[#allocation8 + $0x1fc] ss:$12 sps:$4 sm:$0xff]   ;;  %v6094_v40 = vld [vmem:[#allocation8 + $0x60] ss:$12 sps:$4 sm:$0xff]  }
 0x147   :  { %v6109_v56 = vld [vmem:[#allocation8 + $0x1b0] ss:$12 sps:$4 sm:$0xff]   ;;  %v6135_v9 = vld [vmem:[#allocation8 + $0x2d4] ss:$12 sps:$4 sm:$0xff]  }
 0x148   :  { %v2426_v48 = vmax.f32 %v1980_v42, 0.0  ;;  %2376 = vmatpush1.bf16.msra.mxu0 %v6043_v37  ;;  %v1982_v5 = vadd.f32 %v1981_v2, %v1939_v61  ;;  %v6096_v37 = vld [vmem:[#allocation8 + $0x64] ss:$12 sps:$4 sm:$0xff]   ;;  %v6097_v42 = vld [vmem:[#allocation8 + $0x1e0] ss:$12 sps:$4 sm:$0xff]  }
 0x149   :  { %2349 = vmatpush2.bf16.msra.mxu1 %v6040_v34  ;;  %2377 = vmatprep.subr.bf16.mxu0 %v6051_v39  ;;  %v6117_v58 = vld [vmem:[#allocation8 + $0x19c] ss:$12 sps:$4 sm:$0xff]   ;;  %v6120_v61 = vld [vmem:[#allocation8 + $0x4] ss:$12 sps:$4 sm:$0xff]   ;;  %v6126_v2 = vld [vmem:[#allocation8 + $0x16c] ss:$12 sps:$4 sm:$0xff]  }
 0x14a   :  { %2350 = vmatprep.subr.bf16.mxu1 %v6048_v38  ;;  %v6695_v0 = vpack.c.bf16 %v2426_v48, %v2414_v47  ;;  %v2427_v13 = vmax.f32 %v1982_v5, 0.0  ;;  %v6099_v38 = vld [vmem:[#allocation8 + $0x1e4] ss:$12 sps:$4 sm:$0xff]   ;;  %v6127_v5 = vld [vmem:[#allocation8 + $0x2e8] ss:$12 sps:$4 sm:$0xff]  }
 0x14c   :  { %2378 = vmatpush1.bf16.msra.mxu0 %v6049_v44  ;;  %v6704_v22 = vpack.c.bf16 %v2427_v13, %v2415_v21  ;;  %v6102_v44 = vld [vmem:[#allocation8 + $0x4c] ss:$12 sps:$4 sm:$0xff]  }
 0x14d   :  { %2351 = vmatpush2.bf16.msra.mxu1 %v6046_v43  ;;  %2379 = vmatprep.subr.bf16.mxu0 %v6057_v46  ;;  %v6136_v13 = vld [vmem:[#allocation8 + $0x138] ss:$12 sps:$4 sm:$0xff]   ;;  %v6142_v21 = vld [vmem:[#allocation8 + $0x120] ss:$12 sps:$4 sm:$0xff]  }
 0x14e   :  { %2352 = vmatprep.subr.bf16.mxu1 %v6054_v45  ;;  %v6105_v45 = vld [vmem:[#allocation8 + $0x1cc] ss:$12 sps:$4 sm:$0xff]  }
 0x150   :  { %2380 = vmatpush1.bf16.msra.mxu0 %v6055_v50  ;;  %v6103_v50 = vld [vmem:[#allocation8 + $0x1c8] ss:$12 sps:$4 sm:$0xff]  }
 0x151   :  { %2353 = vmatpush2.bf16.msra.mxu1 %v6052_v49  ;;  %2381 = vmatprep.subr.bf16.mxu0 %v6063_v53  ;;  %v6100_v49 = vld [vmem:[#allocation8 + $0x48] ss:$12 sps:$4 sm:$0xff]  }
 0x152   :  { %2354 = vmatprep.subr.bf16.mxu1 %v6060_v52  ;;  %v6108_v52 = vld [vmem:[#allocation8 + $0x34] ss:$12 sps:$4 sm:$0xff]  }
 0x153   :  { %v6111_v53 = vld [vmem:[#allocation8 + $0x1b4] ss:$12 sps:$4 sm:$0xff]  }
 0x154   :  { %2382 = vmatpush1.bf16.msra.mxu0 %v6061_v57  ;;  %v6114_v57 = vld [vmem:[#allocation8 + $0x1c] ss:$12 sps:$4 sm:$0xff]  }
 0x155   :  { %2355 = vmatpush2.bf16.msra.mxu1 %v6058_v55  ;;  %2383 = vmatprep.subr.bf16.mxu0 %v6069_v60  ;;  %v6106_v55 = vld [vmem:[#allocation8 + $0x30] ss:$12 sps:$4 sm:$0xff]   ;;  %v6115_v60 = vld [vmem:[#allocation8 + $0x198] ss:$12 sps:$4 sm:$0xff]  }
 0x156   :  { %2356 = vmatprep.subr.bf16.mxu1 %v6066_v59  ;;  %v6112_v59 = vld [vmem:[#allocation8 + $0x18] ss:$12 sps:$4 sm:$0xff]  }
 0x158   :  { %2384 = vmatpush1.bf16.msra.mxu0 %v6067_v63  ;;  %v6118_v63 = vld [vmem:[#allocation8] ss:$12 sps:$4 sm:$0xff]  }
 0x159   :  { %2357 = vmatpush2.bf16.msra.mxu1 %v6064_v62  ;;  %2385 = vmatprep.subr.bf16.mxu0 %v6075_v4  ;;  %v6123_v62 = vld [vmem:[#allocation8 + $0x184] ss:$12 sps:$4 sm:$0xff]   ;;  %v6124_v4 = vld [vmem:[#allocation8 + $0x168] ss:$12 sps:$4 sm:$0xff]  }
 0x15a   :  { %2358 = vmatprep.subr.bf16.mxu1 %v6072_v3  ;;  %v6129_v3 = vld [vmem:[#allocation8 + $0x2ec] ss:$12 sps:$4 sm:$0xff]  }
 0x15c   :  { %2386 = vmatpush1.bf16.msra.mxu0 %v6073_v8  ;;  %v6130_v8 = vld [vmem:[#allocation8 + $0x150] ss:$12 sps:$4 sm:$0xff]  }
 0x15d   :  { %2359 = vmatpush2.bf16.msra.mxu1 %v6070_v7  ;;  %4387 = vmatprep.subr.bf16.mxu0 %v6078_v10  ;;  %v6132_v7 = vld [vmem:[#allocation8 + $0x154] ss:$12 sps:$4 sm:$0xff]   ;;  %v6133_v10 = vld [vmem:[#allocation8 + $0x2d0] ss:$12 sps:$4 sm:$0xff]  }
 0x15e   :  { %4430 = vmatprep.subr.bf16.mxu1 %v6081_v11  ;;  %v6138_v11 = vld [vmem:[#allocation8 + $0x13c] ss:$12 sps:$4 sm:$0xff]  }
 0x15f   :  { %v6711_v25 = vpop.f32.mrf.mxu0  ;;  %2404 = vmatmul.mubr.bf16.vlgmr.msra.gmra.mxu0 %v6671_v17 }
 0x160   :  { %v6709_v24 = vpop.f32.mrf.mxu1  ;;  %2361 = vmatmul.mubr.bf16.vlgmr.msra.gmra.mxu1 %v6689_v26  ;;  %4388 = vmatpush1.bf16.msra.mxu0 %v6076_v14  ;;  %v6091_v26 = vld [vmem:[#allocation8 + $0x1f8] ss:$12 sps:$4 sm:$0xff]   ;;  %v6141_v14 = vld [vmem:[#allocation8 + $0x2bc] ss:$12 sps:$4 sm:$0xff]  }
 0x161   :  { %4419 = vmatprep.mubr.bf16.mxu0 %v6704_v22  ;;  %4431 = vmatpush1.bf16.msra.mxu1 %v6079_v19  ;;  %v2063_v29 = vpop.f32.mrf.mxu0  ;;  %v6139_v19 = vld [vmem:[#allocation8 + $0x2b8] ss:$12 sps:$4 sm:$0xff]  }
 0x162   :  { %v2020_v28 = vpop.f32.mrf.mxu1  ;;  %4389 = vmatprep.subr.bf16.mxu0 %v6084_v20  ;;  %4432 = vmatprep.subr.bf16.mxu1 %v6087_v35  ;;  %v6144_v20 = vld [vmem:[#allocation8 + $0x124] ss:$12 sps:$4 sm:$0xff]   ;;  %v6150_v35 = vld [vmem:[#allocation8 + $0x10c] ss:$12 sps:$4 sm:$0xff]  }
 0x163   :  { %v2021_v30 = vadd.f32 %v2020_v28, %v397_v23  ;;  %v6718_v34 = vpop.f32.mrf.mxu0  ;;  %v6153_v28 = vld [vmem:[#allocation8 + $0x28c] ss:$12 sps:$4 sm:$0xff]  }
 0x164   :  { %v6716_v33 = vpop.f32.mrf.mxu1  ;;  %4390 = vmatpush1.bf16.msra.mxu0 %v6082_v6  ;;  %v6145_v6 = vld [vmem:[#allocation8 + $0x2a0] ss:$12 sps:$4 sm:$0xff]  }
 0x165   :  { %v2064_v17 = vadd.f32 %v2063_v29, %v2021_v30  ;;  %4433 = vmatpush1.bf16.msra.mxu1 %v6085_v51  ;;  %4391 = vmatprep.subr.bf16.mxu0 %v6090_v27  ;;  %v2067_v41 = vpop.f32.mrf.mxu0  ;;  %v6724_v51 = vsub.s32 2, %v6680_v12  ;;  %v6148_v27 = vld [vmem:[#allocation8 + $0x108] ss:$12 sps:$4 sm:$0xff]  }
 0x166   :  { %v2024_v36 = vpop.f32.mrf.mxu1  ;;  %4434 = vmatprep.subr.bf16.mxu1 %v6093_v32  ;;  %v6151_v29 = vld [vmem:[#allocation8 + $0x288] ss:$12 sps:$4 sm:$0xff]  }
 0x167   :  { %v2025_v39 = vadd.f32 %v2024_v36, %v397_v23  ;;  %v2417_v46 = vmax.f32 %v2064_v17, 0.0  ;;  %v6147_v23 = vld [vmem:[#allocation8 + $0x2a4] ss:$12 sps:$4 sm:$0xff]   ;;  %v6156_v30 = vld [vmem:[#allocation8 + $0xf4] ss:$12 sps:$4 sm:$0xff]   ;;  %v393_v32 = vrot.slane %v6682_v16, %v6724_v51 }
 0x168   :  { %4392 = vmatpush1.bf16.msra.mxu0 %v6088_v31  ;;  %v6159_v31 = vld [vmem:[#allocation8 + $0x274] ss:$12 sps:$4 sm:$0xff]   ;;  %v6157_v17 = vld [vmem:[#allocation8 + $0x270] ss:$12 sps:$4 sm:$0xff]  }
 0x169   :  { %v2068_v43 = vadd.f32 %v2067_v41, %v2025_v39  ;;  %4435 = vmatpush1.bf16.msra.mxu1 %v6091_v26  ;;  %4393 = vmatprep.subr.bf16.mxu0 %v6096_v37  ;;  %v6154_v26 = vld [vmem:[#allocation8 + $0xf0] ss:$12 sps:$4 sm:$0xff]   ;;  %v2023_v37 = vadd.f32 %v6716_v33, %v393_v32  ;;  %v2019_v39 = vadd.f32 %v6709_v24, %v393_v32  ;;  %v6163_v41 = vld [vmem:[#allocation8 + $0x258] ss:$12 sps:$4 sm:$0xff]   ;;  %v6169_v33 = vld [vmem:[#allocation8 + $0x240] ss:$12 sps:$4 sm:$0xff]  }
 0x16a   :  { %4436 = vmatprep.subr.bf16.mxu1 %v6099_v38  ;;  %v6162_v36 = vld [vmem:[#allocation8 + $0xdc] ss:$12 sps:$4 sm:$0xff]   ;;  %v404_v24 = vsub.s32 5, %v6680_v12  ;;  %v6207_v32 = vld [vmem:[#allocation8 + $0x4b4] ss:$12 sps:$4 sm:$0xff]  }
 0x16b   :  { %v2429_v47 = vmax.f32 %v2068_v43, 0.0  ;;  %v6165_v38 = vld [vmem:[#allocation8 + $0x25c] ss:$12 sps:$4 sm:$0xff]   ;;  %v2066_v43 = vadd.f32 %v6718_v34, %v2023_v37 }
 0x16c   :  { %4394 = vmatpush1.bf16.msra.mxu0 %v6094_v40  ;;  %v6160_v40 = vld [vmem:[#allocation8 + $0xd8] ss:$12 sps:$4 sm:$0xff]   ;;  %v6175_v34 = vld [vmem:[#allocation8 + $0x528] ss:$12 sps:$4 sm:$0xff]  }
 0x16d   :  { %v6720_v48 = vpack.c.bf16 %v2429_v47, %v2417_v46  ;;  %4437 = vmatpush1.bf16.msra.mxu1 %v6097_v42  ;;  %4395 = vmatprep.subr.bf16.mxu0 %v6102_v44  ;;  %v6168_v42 = vld [vmem:[#allocation8 + $0xc4] ss:$12 sps:$4 sm:$0xff]   ;;  %v2062_v46 = vadd.f32 %v6711_v25, %v2019_v39  ;;  %v6174_v47 = vld [vmem:[#allocation8 + $0x3ac] ss:$12 sps:$4 sm:$0xff]   ;;  %v6213_v37 = vld [vmem:[#allocation8 + $0x49c] ss:$12 sps:$4 sm:$0xff]  }
 0x16e   :  { %4438 = vmatprep.subr.bf16.mxu1 %v6105_v45  ;;  %v6171_v44 = vld [vmem:[#allocation8 + $0x244] ss:$12 sps:$4 sm:$0xff]   ;;  %v6166_v45 = vld [vmem:[#allocation8 + $0xc0] ss:$12 sps:$4 sm:$0xff]  }
 0x16f   :  { %4462 = vmatprep.mubr.bf16.mxu1 %v6720_v48  ;;  %v6211_v39 = vld [vmem:[#allocation8 + $0x498] ss:$12 sps:$4 sm:$0xff]  }
 0x170   :  { %4396 = vmatpush1.bf16.msra.mxu0 %v6100_v49  ;;  %v6177_v49 = vld [vmem:[#allocation8 + $0x52c] ss:$12 sps:$4 sm:$0xff]  }
 0x171   :  { %4439 = vmatpush1.bf16.msra.mxu1 %v6103_v50  ;;  %4397 = vmatprep.subr.bf16.mxu0 %v6108_v52  ;;  %v2428_v50 = vmax.f32 %v2066_v43, 0.0  ;;  %v6172_v52 = vld [vmem:[#allocation8 + $0x3a8] ss:$12 sps:$4 sm:$0xff]   ;;  %v6217_v43 = vld [vmem:[#allocation8 + $0x480] ss:$12 sps:$4 sm:$0xff]  }
 0x172   :  { %4440 = vmatprep.subr.bf16.mxu1 %v6111_v53 }
 0x174   :  { %4398 = vmatpush1.bf16.msra.mxu0 %v6106_v55  ;;  %v2416_v55 = vmax.f32 %v2062_v46, 0.0  ;;  %v412_v46 = vsub.s32 7, %v6680_v12 }
 0x175   :  { %4441 = vmatpush1.bf16.msra.mxu1 %v6109_v56  ;;  %4399 = vmatprep.subr.bf16.mxu0 %v6114_v57  ;;  %v6180_v56 = vld [vmem:[#allocation8 + $0x394] ss:$12 sps:$4 sm:$0xff]   ;;  %v405_v57 = vrot.slane %v6682_v16, %v404_v24 }
 0x176   :  { %4442 = vmatprep.subr.bf16.mxu1 %v6117_v58  ;;  %v6735_v25 = vpack.c.bf16 %v2428_v50, %v2416_v55  ;;  %v6178_v58 = vld [vmem:[#allocation8 + $0x390] ss:$12 sps:$4 sm:$0xff]   ;;  %v6463_v50 = vld [vmem:[#allocation7] sm:$0xff] }
 0x177   :  { %v413_v24 = vrot.slane %v6463_v50, %v412_v46  ;;  %v6256_v46 = vld [vmem:[#allocation8 + $0x3d8] ss:$12 sps:$4 sm:$0xff]  }
 0x178   :  { %4400 = vmatpush1.bf16.msra.mxu0 %v6112_v59  ;;  %v6183_v59 = vld [vmem:[#allocation8 + $0x514] ss:$12 sps:$4 sm:$0xff]  }
 0x179   :  { %4443 = vmatpush1.bf16.msra.mxu1 %v6115_v60  ;;  %4401 = vmatprep.subr.bf16.mxu0 %v6120_v61 }
 0x17a   :  { %4444 = vmatprep.subr.bf16.mxu1 %v6123_v62  ;;  %v6181_v62 = vld [vmem:[#allocation8 + $0x510] ss:$12 sps:$4 sm:$0xff]  }
 0x17c   :  { %4402 = vmatpush1.bf16.msra.mxu0 %v6118_v63 }
 0x17d   :  { %4445 = vmatpush1.bf16.msra.mxu1 %v6121_v1  ;;  %4403 = vmatprep.subr.bf16.mxu0 %v6126_v2  ;;  %v6186_v1 = vld [vmem:[#allocation8 + $0x37c] ss:$12 sps:$4 sm:$0xff]  }
 0x17e   :  { %4446 = vmatprep.subr.bf16.mxu1 %v6129_v3  ;;  %v6189_v3 = vld [vmem:[#allocation8 + $0x4fc] ss:$12 sps:$4 sm:$0xff]  }
 0x180   :  { %4404 = vmatpush2.bf16.msra.mxu0 %v6124_v4  ;;  %v6733_v53 = vpop.f32.mrf.mxu1 }
 0x181   :  { %4447 = vmatpush2.bf16.msra.mxu1 %v6127_v5  ;;  %4405 = vmatprep.subr.bf16.mxu0 %v6132_v7  ;;  %v6184_v5 = vld [vmem:[#allocation8 + $0x378] ss:$12 sps:$4 sm:$0xff]  }
 0x182   :  { %4448 = vmatprep.subr.bf16.mxu1 %v6135_v9  ;;  %v2149_v60 = vpop.f32.mrf.mxu1  ;;  %v6187_v7 = vld [vmem:[#allocation8 + $0x4f8] ss:$12 sps:$4 sm:$0xff]  }
 0x183   :  { %v6192_v9 = vld [vmem:[#allocation8 + $0x364] ss:$12 sps:$4 sm:$0xff]  }
 0x184   :  { %4406 = vmatpush2.bf16.msra.mxu0 %v6130_v8  ;;  %v6742_v4 = vpop.f32.mrf.mxu1 }
 0x185   :  { %4449 = vmatpush2.bf16.msra.mxu1 %v6133_v10  ;;  %4407 = vmatprep.subr.bf16.mxu0 %v6138_v11 }
 0x186   :  { %4450 = vmatprep.subr.bf16.mxu1 %v6141_v14  ;;  %v2153_v14 = vpop.f32.mrf.mxu1 }
 0x188   :  { %4408 = vmatpush2.bf16.msra.mxu0 %v6136_v13  ;;  %v6195_v13 = vld [vmem:[#allocation8 + $0x4e4] ss:$12 sps:$4 sm:$0xff]  }
 0x189   :  { %4451 = vmatpush2.bf16.msra.mxu1 %v6139_v19  ;;  %4409 = vmatprep.subr.bf16.mxu0 %v6144_v20  ;;  %v6190_v19 = vld [vmem:[#allocation8 + $0x360] ss:$12 sps:$4 sm:$0xff]  }
 0x18a   :  { %4452 = vmatprep.subr.bf16.mxu1 %v6147_v23  ;;  %v6198_v23 = vld [vmem:[#allocation8 + $0x34c] ss:$12 sps:$4 sm:$0xff]  }
 0x18c   :  { %4410 = vmatpush2.bf16.msra.mxu0 %v6142_v21  ;;  %v6193_v21 = vld [vmem:[#allocation8 + $0x4e0] ss:$12 sps:$4 sm:$0xff]  }
 0x18d   :  { %4453 = vmatpush2.bf16.msra.mxu1 %v6145_v6  ;;  %4411 = vmatprep.subr.bf16.mxu0 %v6150_v35 }
 0x18e   :  { %4454 = vmatprep.subr.bf16.mxu1 %v6153_v28  ;;  %v6201_v28 = vld [vmem:[#allocation8 + $0x4cc] ss:$12 sps:$4 sm:$0xff]  }
 0x190   :  { %4412 = vmatpush2.bf16.msra.mxu0 %v6148_v27  ;;  %v6196_v27 = vld [vmem:[#allocation8 + $0x348] ss:$12 sps:$4 sm:$0xff]  }
 0x191   :  { %4455 = vmatpush2.bf16.msra.mxu1 %v6151_v29  ;;  %4413 = vmatprep.subr.bf16.mxu0 %v6156_v30  ;;  %v6199_v29 = vld [vmem:[#allocation8 + $0x4c8] ss:$12 sps:$4 sm:$0xff]  }
 0x192   :  { %4456 = vmatprep.subr.bf16.mxu1 %v6159_v31  ;;  %v6204_v31 = vld [vmem:[#allocation8 + $0x334] ss:$12 sps:$4 sm:$0xff]  }
 0x194   :  { %4414 = vmatpush2.bf16.msra.mxu0 %v6154_v26  ;;  %v6202_v26 = vld [vmem:[#allocation8 + $0x330] ss:$12 sps:$4 sm:$0xff]  }
 0x195   :  { %4457 = vmatpush2.bf16.msra.mxu1 %v6157_v17  ;;  %4415 = vmatprep.subr.bf16.mxu0 %v6162_v36  ;;  %v6205_v17 = vld [vmem:[#allocation8 + $0x4b0] ss:$12 sps:$4 sm:$0xff]  }
 0x196   :  { %4458 = vmatprep.subr.bf16.mxu1 %v6165_v38  ;;  %v6210_v36 = vld [vmem:[#allocation8 + $0x31c] ss:$12 sps:$4 sm:$0xff]   ;;  %v6208_v38 = vld [vmem:[#allocation8 + $0x318] ss:$12 sps:$4 sm:$0xff]  }
 0x198   :  { %4416 = vmatpush2.bf16.msra.mxu0 %v6160_v40  ;;  %v6216_v40 = vld [vmem:[#allocation8 + $0x304] ss:$12 sps:$4 sm:$0xff]  }
 0x199   :  { %4459 = vmatpush2.bf16.msra.mxu1 %v6163_v41  ;;  %4417 = vmatprep.subr.bf16.mxu0 %v6168_v42  ;;  %v6219_v41 = vld [vmem:[#allocation8 + $0x484] ss:$12 sps:$4 sm:$0xff]   ;;  %v6214_v42 = vld [vmem:[#allocation8 + $0x300] ss:$12 sps:$4 sm:$0xff]  }
 0x19a   :  { %4460 = vmatprep.subr.bf16.mxu1 %v6171_v44  ;;  %v6222_v44 = vld [vmem:[#allocation8 + $0x46c] ss:$12 sps:$4 sm:$0xff]  }
 0x19c   :  { %4418 = vmatpush2.bf16.msra.mxu0 %v6166_v45  ;;  %v6225_v45 = vld [vmem:[#allocation8 + $0x5ec] ss:$12 sps:$4 sm:$0xff]  }
 0x19d   :  { %4461 = vmatpush2.bf16.msra.mxu1 %v6169_v33  ;;  %4473 = vmatprep.subr.bf16.mxu0 %v6174_v47  ;;  %v6220_v33 = vld [vmem:[#allocation8 + $0x468] ss:$12 sps:$4 sm:$0xff]  }
 0x19e   :  { %4516 = vmatprep.subr.bf16.mxu1 %v6177_v49  ;;  %v6223_v47 = vld [vmem:[#allocation8 + $0x5e8] ss:$12 sps:$4 sm:$0xff]  }
 0x19f   :  { %v6738_v61 = vpop.f32.mrf.mxu0  ;;  %4420 = vmatmul.mubr.bf16.vlgmr.msra.gmra.mxu0 %v6695_v0  ;;  %v6228_v49 = vld [vmem:[#allocation8 + $0x454] ss:$12 sps:$4 sm:$0xff]  }
 0x1a0   :  { %4463 = vmatmul.mubr.bf16.vlgmr.msra.gmra.mxu1 %v6735_v25  ;;  %4474 = vmatpush1.bf16.msra.mxu0 %v6172_v52  ;;  %v6231_v52 = vld [vmem:[#allocation8 + $0x5d4] ss:$12 sps:$4 sm:$0xff]  }
 0x1a1   :  { %4517 = vmatpush1.bf16.msra.mxu1 %v6175_v34  ;;  %v2106_v63 = vpop.f32.mrf.mxu0  ;;  %4475 = vmatprep.subr.bf16.mxu0 %v6180_v56  ;;  %v6226_v56 = vld [vmem:[#allocation8 + $0x450] ss:$12 sps:$4 sm:$0xff]  }
 0x1a2   :  { %v2107_v2 = vadd.f32 %v2106_v63, %v405_v57  ;;  %4518 = vmatprep.subr.bf16.mxu1 %v6183_v59  ;;  %v6229_v59 = vld [vmem:[#allocation8 + $0x5d0] ss:$12 sps:$4 sm:$0xff]  }
 0x1a3   :  { %v6744_v16 = vpop.f32.mrf.mxu0  ;;  %v6237_v63 = vld [vmem:[#allocation8 + $0x5bc] ss:$12 sps:$4 sm:$0xff]  }
 0x1a4   :  { %4476 = vmatpush1.bf16.msra.mxu0 %v6178_v58  ;;  %v2150_v10 = vadd.f32 %v2149_v60, %v2107_v2  ;;  %v6234_v60 = vld [vmem:[#allocation8 + $0x43c] ss:$12 sps:$4 sm:$0xff]  }
 0x1a5   :  { %4519 = vmatpush1.bf16.msra.mxu1 %v6181_v62  ;;  %v2110_v8 = vpop.f32.mrf.mxu0  ;;  %4477 = vmatprep.subr.bf16.mxu0 %v6186_v1 }
 0x1a6   :  { %v2111_v11 = vadd.f32 %v2110_v8, %v405_v57  ;;  %4520 = vmatprep.subr.bf16.mxu1 %v6189_v3  ;;  %v2419_v6 = vmax.f32 %v2150_v10, 0.0  ;;  %v6232_v3 = vld [vmem:[#allocation8 + $0x438] ss:$12 sps:$4 sm:$0xff]  }
 0x1a7   :  { %v6240_v8 = vld [vmem:[#allocation8 + $0x424] ss:$12 sps:$4 sm:$0xff]  }
 0x1a8   :  { %v2154_v20 = vadd.f32 %v2153_v14, %v2111_v11  ;;  %4478 = vmatpush1.bf16.msra.mxu0 %v6184_v5  ;;  %v6235_v5 = vld [vmem:[#allocation8 + $0x5b8] ss:$12 sps:$4 sm:$0xff]   ;;  %v408_v14 = vsub.s32 6, %v6680_v12 }
 0x1a9   :  { %4521 = vmatpush1.bf16.msra.mxu1 %v6187_v7  ;;  %4479 = vmatprep.subr.bf16.mxu0 %v6192_v9  ;;  %v6243_v11 = vld [vmem:[#allocation8 + $0x5a4] ss:$12 sps:$4 sm:$0xff]  }
 0x1aa   :  { %v2431_v35 = vmax.f32 %v2154_v20, 0.0  ;;  %4522 = vmatprep.subr.bf16.mxu1 %v6195_v13  ;;  %v400_v13 = vsub.s32 4, %v6680_v12 }
 0x1ac   :  { %4480 = vmatpush1.bf16.msra.mxu0 %v6190_v19  ;;  %v6746_v30 = vpack.c.bf16 %v2431_v35, %v2419_v6  ;;  %v6246_v6 = vld [vmem:[#allocation8 + $0x40c] ss:$12 sps:$4 sm:$0xff]  }
 0x1ad   :  { %4523 = vmatpush1.bf16.msra.mxu1 %v6193_v21  ;;  %4481 = vmatprep.subr.bf16.mxu0 %v6198_v23  ;;  %v6238_v21 = vld [vmem:[#allocation8 + $0x420] ss:$12 sps:$4 sm:$0xff]  }
 0x1ae   :  { %4505 = vmatprep.mubr.bf16.mxu0 %v6746_v30  ;;  %4524 = vmatprep.subr.bf16.mxu1 %v6201_v28  ;;  %v6241_v23 = vld [vmem:[#allocation8 + $0x5a0] ss:$12 sps:$4 sm:$0xff]   ;;  %v6244_v28 = vld [vmem:[#allocation8 + $0x408] ss:$12 sps:$4 sm:$0xff]  }
 0x1b0   :  { %4482 = vmatpush1.bf16.msra.mxu0 %v6196_v27 }
 0x1b1   :  { %4525 = vmatpush1.bf16.msra.mxu1 %v6199_v29  ;;  %4483 = vmatprep.subr.bf16.mxu0 %v6204_v31  ;;  %v6249_v29 = vld [vmem:[#allocation8 + $0x58c] ss:$12 sps:$4 sm:$0xff]   ;;  %v6247_v31 = vld [vmem:[#allocation8 + $0x588] ss:$12 sps:$4 sm:$0xff]  }
 0x1b2   :  { %4526 = vmatprep.subr.bf16.mxu1 %v6207_v32 }
 0x1b4   :  { %4484 = vmatpush1.bf16.msra.mxu0 %v6202_v26  ;;  %v6252_v26 = vld [vmem:[#allocation8 + $0x3f4] ss:$12 sps:$4 sm:$0xff]  }
 0x1b5   :  { %4527 = vmatpush1.bf16.msra.mxu1 %v6205_v17  ;;  %4485 = vmatprep.subr.bf16.mxu0 %v6210_v36  ;;  %v6255_v17 = vld [vmem:[#allocation8 + $0x574] ss:$12 sps:$4 sm:$0xff]   ;;  %v401_v36 = vrot.slane %v6463_v50, %v400_v13  ;;  %v6300_v13 = vld [vmem:[#allocation8 + $0x7e4] ss:$12 sps:$4 sm:$0xff]  }
 0x1b6   :  { %4528 = vmatprep.subr.bf16.mxu1 %v6213_v37  ;;  %v409_v37 = vrot.slane %v6463_v50, %v408_v14  ;;  %v6267_v50 = vld [vmem:[#allocation8 + $0x544] ss:$12 sps:$4 sm:$0xff]   ;;  %v6277_v14 = vld [vmem:[#allocation8 + $0x660] ss:$12 sps:$4 sm:$0xff]  }
 0x1b8   :  { %4486 = vmatpush1.bf16.msra.mxu0 %v6208_v38  ;;  %v6250_v38 = vld [vmem:[#allocation8 + $0x3f0] ss:$12 sps:$4 sm:$0xff]  }
 0x1b9   :  { %4529 = vmatpush1.bf16.msra.mxu1 %v6211_v39  ;;  %4487 = vmatprep.subr.bf16.mxu0 %v6216_v40  ;;  %v2109_v39 = vadd.f32 %v6744_v16, %v401_v36  ;;  %v6253_v40 = vld [vmem:[#allocation8 + $0x570] ss:$12 sps:$4 sm:$0xff]  }
 0x1ba   :  { %4530 = vmatprep.subr.bf16.mxu1 %v6219_v41  ;;  %v6258_v41 = vld [vmem:[#allocation8 + $0x3dc] ss:$12 sps:$4 sm:$0xff]  }
 0x1bc   :  { %4488 = vmatpush1.bf16.msra.mxu0 %v6214_v42 }
 0x1bd   :  { %4531 = vmatpush1.bf16.msra.mxu1 %v6217_v43  ;;  %4489 = vmatprep.subr.bf16.mxu0 %v6222_v44  ;;  %v6261_v43 = vld [vmem:[#allocation8 + $0x55c] ss:$12 sps:$4 sm:$0xff]   ;;  %v2105_v44 = vadd.f32 %v6738_v61, %v401_v36  ;;  %v6303_v36 = vld [vmem:[#allocation8 + $0x604] ss:$12 sps:$4 sm:$0xff]  }
 0x1be   :  { %4532 = vmatprep.subr.bf16.mxu1 %v6225_v45 }
 0x1bf   :  { %v6752_v55 = vpop.f32.mrf.mxu0 }
 0x1c0   :  { %v6750_v34 = vpop.f32.mrf.mxu1  ;;  %4490 = vmatpush2.bf16.msra.mxu0 %v6220_v33  ;;  %v2152_v33 = vadd.f32 %v6742_v4, %v2109_v39  ;;  %v6282_v4 = vld [vmem:[#allocation8 + $0x82c] ss:$12 sps:$4 sm:$0xff]  }
 0x1c1   :  { %4533 = vmatpush2.bf16.msra.mxu1 %v6223_v47  ;;  %v2235_v58 = vpop.f32.mrf.mxu0  ;;  %4491 = vmatprep.subr.bf16.mxu0 %v6228_v49  ;;  %v2191_v45 = vadd.f32 %v6750_v34, %v409_v37  ;;  %v6259_v47 = vld [vmem:[#allocation8 + $0x558] ss:$12 sps:$4 sm:$0xff]   ;;  %v6265_v34 = vld [vmem:[#allocation8 + $0x540] ss:$12 sps:$4 sm:$0xff]  }
 0x1c2   :  { %v2192_v57 = vpop.f32.mrf.mxu1  ;;  %4534 = vmatprep.subr.bf16.mxu1 %v6231_v52  ;;  %v6264_v49 = vld [vmem:[#allocation8 + $0x3c4] ss:$12 sps:$4 sm:$0xff]   ;;  %v2430_v61 = vmax.f32 %v2152_v33, 0.0  ;;  %v6301_v39 = vld [vmem:[#allocation8 + $0x600] ss:$12 sps:$4 sm:$0xff]  }
 0x1c3   :  { %v2193_v62 = vadd.f32 %v2192_v57, %v413_v24  ;;  %v2237_v2 = vpop.f32.mrf.mxu0  ;;  %v2234_v52 = vadd.f32 %v6752_v55, %v2191_v45  ;;  %v6270_v57 = vld [vmem:[#allocation8 + $0x6ac] ss:$12 sps:$4 sm:$0xff]   ;;  %v6280_v55 = vld [vmem:[#allocation8 + $0x828] ss:$12 sps:$4 sm:$0xff]   ;;  %v6773_v45 = vld [vmem:[#allocation7 + $0x8] sm:$0xf] }
 0x1c4   :  { %v2194_v1 = vpop.f32.mrf.mxu1  ;;  %4492 = vmatpush2.bf16.msra.mxu0 %v6226_v56  ;;  %v6262_v56 = vld [vmem:[#allocation8 + $0x3c0] ss:$12 sps:$4 sm:$0xff]   ;;  %v6328_v33 = vld [vmem:[#allocation8 + $0x8e8] ss:$12 sps:$4 sm:$0xff]  }
 0x1c5   :  { %4535 = vmatpush2.bf16.msra.mxu1 %v6229_v59  ;;  %4493 = vmatprep.subr.bf16.mxu0 %v6234_v60  ;;  %v2236_v9 = vadd.f32 %v2235_v58, %v2193_v62  ;;  %v2239_v19 = vpop.f32.mrf.mxu0  ;;  %v2195_v42 = vadd.f32 %v2194_v1, %v409_v37  ;;  %v2420_v60 = vmax.f32 %v2234_v52, 0.0  ;;  %v6268_v62 = vld [vmem:[#allocation8 + $0x6a8] ss:$12 sps:$4 sm:$0xff]   ;;  %v6316_v37 = vld [vmem:[#allocation8 + $0x798] ss:$12 sps:$4 sm:$0xff]  }
 0x1c6   :  { %v2196_v7 = vpop.f32.mrf.mxu1  ;;  %4536 = vmatprep.subr.bf16.mxu1 %v6237_v63 }
 0x1c7   :  { %v2197_v10 = vadd.f32 %v2196_v7, %v413_v24  ;;  %v2421_v35 = vmax.f32 %v2236_v9, 0.0  ;;  %v2238_v16 = vadd.f32 %v2237_v2, %v2195_v42  ;;  %v2148_v24 = vadd.f32 %v6733_v53, %v2105_v44  ;;  %v6273_v53 = vld [vmem:[#allocation8 + $0x694] ss:$12 sps:$4 sm:$0xff]   ;;  %v6286_v7 = vld [vmem:[#allocation8 + $0x810] ss:$12 sps:$4 sm:$0xff]  }
 0x1c8   :  { %4494 = vmatpush2.bf16.msra.mxu0 %v6232_v3  ;;  %v6288_v2 = vld [vmem:[#allocation8 + $0x814] ss:$12 sps:$4 sm:$0xff]   ;;  %v6271_v3 = vld [vmem:[#allocation8 + $0x690] ss:$12 sps:$4 sm:$0xff]   ;;  %v6274_v9 = vld [vmem:[#allocation8 + $0x678] ss:$12 sps:$4 sm:$0xff]  }
 0x1c9   :  { %v2240_v20 = vadd.f32 %v2239_v19, %v2197_v10  ;;  %4537 = vmatpush2.bf16.msra.mxu1 %v6235_v5  ;;  %4495 = vmatprep.subr.bf16.mxu0 %v6240_v8  ;;  %v2432_v58 = vmax.f32 %v2238_v16, 0.0  ;;  %v2418_v59 = vmax.f32 %v2148_v24, 0.0  ;;  %v6276_v5 = vld [vmem:[#allocation8 + $0x67c] ss:$12 sps:$4 sm:$0xff]   ;;  %v6279_v10 = vld [vmem:[#allocation8 + $0x664] ss:$12 sps:$4 sm:$0xff]  }
 0x1ca   :  { %4538 = vmatprep.subr.bf16.mxu1 %v6243_v11  ;;  %v6294_v8 = vld [vmem:[#allocation8 + $0x7fc] ss:$12 sps:$4 sm:$0xff]   ;;  %v6292_v11 = vld [vmem:[#allocation8 + $0x7f8] ss:$12 sps:$4 sm:$0xff]  }
 0x1cb   :  { %v2433_v27 = vmax.f32 %v2240_v20, 0.0  ;;  %v6765_v63 = vpack.c.bf16 %v2430_v61, %v2418_v59  ;;  %v6767_v1 = vpack.c.bf16 %v2432_v58, %v2420_v60  ;;  %v6285_v19 = vld [vmem:[#allocation8 + $0x64c] ss:$12 sps:$4 sm:$0xff]   ;;  %v6307_v44 = vld [vmem:[#allocation8 + $0x768] ss:$12 sps:$4 sm:$0xff]  }
 0x1cc   :  { %4496 = vmatpush2.bf16.msra.mxu0 %v6238_v21  ;;  %v6298_v20 = vld [vmem:[#allocation8 + $0x7e0] ss:$12 sps:$4 sm:$0xff]   ;;  %v6313_v24 = vld [vmem:[#allocation8 + $0x750] ss:$12 sps:$4 sm:$0xff]   ;;  %v6319_v59 = vld [vmem:[#allocation8 + $0x738] ss:$12 sps:$4 sm:$0xff]  }
 0x1cd   :  { %v6756_v32 = vpack.c.bf16 %v2433_v27, %v2421_v35  ;;  %4539 = vmatpush2.bf16.msra.mxu1 %v6241_v23  ;;  %4497 = vmatprep.subr.bf16.mxu0 %v6246_v6  ;;  %v6306_v21 = vld [vmem:[#allocation8 + $0x7cc] ss:$12 sps:$4 sm:$0xff]   ;;  %v6283_v23 = vld [vmem:[#allocation8 + $0x648] ss:$12 sps:$4 sm:$0xff]   ;;  %v6334_v61 = vld [vmem:[#allocation8 + $0x8d0] ss:$12 sps:$4 sm:$0xff]  }
 0x1ce   :  { %4540 = vmatprep.subr.bf16.mxu1 %v6249_v29  ;;  %v6291_v6 = vld [vmem:[#allocation8 + $0x634] ss:$12 sps:$4 sm:$0xff]   ;;  %v6297_v29 = vld [vmem:[#allocation8 + $0x61c] ss:$12 sps:$4 sm:$0xff]   ;;  %v6330_v42 = vld [vmem:[#allocation8 + $0x8ec] ss:$12 sps:$4 sm:$0xff]  }
 0x1cf   :  { %4548 = vmatprep.mubr.bf16.mxu1 %v6756_v32  ;;  %v6304_v35 = vld [vmem:[#allocation8 + $0x7c8] ss:$12 sps:$4 sm:$0xff]  }
 0x1d0   :  { %4498 = vmatpush2.bf16.msra.mxu0 %v6244_v28  ;;  %v6312_v27 = vld [vmem:[#allocation8 + $0x7b4] ss:$12 sps:$4 sm:$0xff]   ;;  %v6289_v28 = vld [vmem:[#allocation8 + $0x630] ss:$12 sps:$4 sm:$0xff]  }
 0x1d1   :  { %4541 = vmatpush2.bf16.msra.mxu1 %v6247_v31  ;;  %4499 = vmatprep.subr.bf16.mxu0 %v6252_v26  ;;  %v6310_v31 = vld [vmem:[#allocation8 + $0x7b0] ss:$12 sps:$4 sm:$0xff]  }
 0x1d2   :  { %4542 = vmatprep.subr.bf16.mxu1 %v6255_v17  ;;  %v6318_v26 = vld [vmem:[#allocation8 + $0x79c] ss:$12 sps:$4 sm:$0xff]   ;;  %v6295_v17 = vld [vmem:[#allocation8 + $0x618] ss:$12 sps:$4 sm:$0xff]  }
 0x1d4   :  { %4500 = vmatpush2.bf16.msra.mxu0 %v6250_v38  ;;  %v6324_v38 = vld [vmem:[#allocation8 + $0x784] ss:$12 sps:$4 sm:$0xff]  }
 0x1d5   :  { %4543 = vmatpush2.bf16.msra.mxu1 %v6253_v40  ;;  %4501 = vmatprep.subr.bf16.mxu0 %v6258_v41  ;;  %v6309_v40 = vld [vmem:[#allocation8 + $0x76c] ss:$12 sps:$4 sm:$0xff]  }
 0x1d6   :  { %4544 = vmatprep.subr.bf16.mxu1 %v6261_v43  ;;  %v6322_v41 = vld [vmem:[#allocation8 + $0x780] ss:$12 sps:$4 sm:$0xff]  }
 0x1d8   :  { %4502 = vmatpush2.bf16.msra.mxu0 %v6256_v46  ;;  %v6315_v46 = vld [vmem:[#allocation8 + $0x754] ss:$12 sps:$4 sm:$0xff]  }
 0x1d9   :  { %4545 = vmatpush2.bf16.msra.mxu1 %v6259_v47  ;;  %4503 = vmatprep.subr.bf16.mxu0 %v6264_v49  ;;  %v421_v47 = vrot.slane %v6773_v45, %v6698_v54  ;;  %v6336_v49 = vld [vmem:[#allocation8 + $0x8d4] ss:$12 sps:$4 sm:$0xff]  }
 0x1da   :  { %4546 = vmatprep.subr.bf16.mxu1 %v6267_v50 }
 0x1dc   :  { %4504 = vmatpush2.bf16.msra.mxu0 %v6262_v56  ;;  %v6321_v56 = vld [vmem:[#allocation8 + $0x73c] ss:$12 sps:$4 sm:$0xff]  }
 0x1dd   :  { %4547 = vmatpush2.bf16.msra.mxu1 %v6265_v34  ;;  %4559 = vmatprep.subr.bf16.mxu0 %v6270_v57  ;;  %v6342_v57 = vld [vmem:[#allocation8 + $0x8bc] ss:$12 sps:$4 sm:$0xff]  }
 0x1de   :  { %4602 = vmatprep.subr.bf16.mxu1 %v6282_v4 }
 0x1df   :  { %4506 = vmatmul.mubr.bf16.vlgmr.msra.gmra.mxu0 %v6765_v63 }
 0x1e0   :  { %4549 = vmatmul.mubr.bf16.vlgmr.msra.gmra.mxu1 %v6767_v1  ;;  %4560 = vmatpush1.bf16.msra.mxu0 %v6268_v62  ;;  %v6771_v43 = vpop.f32.mrf.mxu1  ;;  %v6327_v62 = vld [vmem:[#allocation8 + $0x724] ss:$12 sps:$4 sm:$0xff]  }
 0x1e1   :  { %4561 = vmatprep.subr.bf16.mxu0 %v6273_v53  ;;  %4603 = vmatpush1.bf16.msra.mxu1 %v6280_v55  ;;  %v6340_v53 = vld [vmem:[#allocation8 + $0x8b8] ss:$12 sps:$4 sm:$0xff]  }
 0x1e2   :  { %4604 = vmatprep.subr.bf16.mxu1 %v6288_v2  ;;  %v2321_v16 = vpop.f32.mrf.mxu1 }
 0x1e4   :  { %4562 = vmatpush1.bf16.msra.mxu0 %v6271_v3  ;;  %v2323_v58 = vpop.f32.mrf.mxu1  ;;  %v6348_v3 = vld [vmem:[#allocation8 + $0x8a4] ss:$12 sps:$4 sm:$0xff]  }
 0x1e5   :  { %4563 = vmatprep.subr.bf16.mxu0 %v6276_v5  ;;  %4605 = vmatpush1.bf16.msra.mxu1 %v6286_v7 }
 0x1e6   :  { %4606 = vmatprep.subr.bf16.mxu1 %v6294_v8  ;;  %v2325_v5 = vpop.f32.mrf.mxu1  ;;  %v6325_v8 = vld [vmem:[#allocation8 + $0x720] ss:$12 sps:$4 sm:$0xff]  }
 0x1e8   :  { %4564 = vmatpush1.bf16.msra.mxu0 %v6274_v9  ;;  %v6333_v9 = vld [vmem:[#allocation8 + $0x70c] ss:$12 sps:$4 sm:$0xff]  }
 0x1e9   :  { %4565 = vmatprep.subr.bf16.mxu0 %v6279_v10  ;;  %4607 = vmatpush1.bf16.msra.mxu1 %v6292_v11  ;;  %v6346_v10 = vld [vmem:[#allocation8 + $0x8a0] ss:$12 sps:$4 sm:$0xff]  }
 0x1ea   :  { %4608 = vmatprep.subr.bf16.mxu1 %v6300_v13 }
 0x1ec   :  { %4566 = vmatpush1.bf16.msra.mxu0 %v6277_v14  ;;  %v6354_v14 = vld [vmem:[#allocation8 + $0x88c] ss:$12 sps:$4 sm:$0xff]  }
 0x1ed   :  { %4567 = vmatprep.subr.bf16.mxu0 %v6285_v19  ;;  %4609 = vmatpush1.bf16.msra.mxu1 %v6298_v20  ;;  %v6331_v20 = vld [vmem:[#allocation8 + $0x708] ss:$12 sps:$4 sm:$0xff]  }
 0x1ee   :  { %4610 = vmatprep.subr.bf16.mxu1 %v6306_v21  ;;  %v6339_v21 = vld [vmem:[#allocation8 + $0x6f4] ss:$12 sps:$4 sm:$0xff]  }
 0x1f0   :  { %4568 = vmatpush1.bf16.msra.mxu0 %v6283_v23  ;;  %v6352_v23 = vld [vmem:[#allocation8 + $0x888] ss:$12 sps:$4 sm:$0xff]  }
 0x1f1   :  { %4569 = vmatprep.subr.bf16.mxu0 %v6291_v6  ;;  %4611 = vmatpush1.bf16.msra.mxu1 %v6304_v35  ;;  %v6359_v6 = vld [vmem:[#allocation8 + $0x874] ss:$12 sps:$4 sm:$0xff]   ;;  %v417_v35 = vrot.slane %v6773_v45, %v6685_v18 }
 0x1f2   :  { %4612 = vmatprep.subr.bf16.mxu1 %v6312_v27  ;;  %v6337_v27 = vld [vmem:[#allocation8 + $0x6f0] ss:$12 sps:$4 sm:$0xff]  }
 0x1f4   :  { %4570 = vmatpush1.bf16.msra.mxu0 %v6289_v28 }
 0x1f5   :  { %4571 = vmatprep.subr.bf16.mxu0 %v6297_v29  ;;  %4613 = vmatpush1.bf16.msra.mxu1 %v6310_v31  ;;  %v6345_v29 = vld [vmem:[#allocation8 + $0x6dc] ss:$12 sps:$4 sm:$0xff]  }
 0x1f6   :  { %4614 = vmatprep.subr.bf16.mxu1 %v6318_v26  ;;  %v6357_v31 = vld [vmem:[#allocation8 + $0x870] ss:$12 sps:$4 sm:$0xff]  }
 0x1f7   :  { %v6364_v26 = vld [vmem:[#allocation8 + $0x85c] ss:$12 sps:$4 sm:$0xff]  }
 0x1f8   :  { %4572 = vmatpush1.bf16.msra.mxu0 %v6295_v17 }
 0x1f9   :  { %4573 = vmatprep.subr.bf16.mxu0 %v6303_v36  ;;  %4615 = vmatpush1.bf16.msra.mxu1 %v6316_v37  ;;  %v6343_v36 = vld [vmem:[#allocation8 + $0x6d8] ss:$12 sps:$4 sm:$0xff]  }
 0x1fa   :  { %4616 = vmatprep.subr.bf16.mxu1 %v6324_v38  ;;  %v6351_v38 = vld [vmem:[#allocation8 + $0x6c4] ss:$12 sps:$4 sm:$0xff]  }
 0x1fc   :  { %4574 = vmatpush1.bf16.msra.mxu0 %v6301_v39  ;;  %v6362_v39 = vld [vmem:[#allocation8 + $0x858] ss:$12 sps:$4 sm:$0xff]  }
 0x1fd   :  { %4575 = vmatprep.subr.bf16.mxu0 %v6309_v40  ;;  %4617 = vmatpush1.bf16.msra.mxu1 %v6322_v41  ;;  %v6369_v40 = vld [vmem:[#allocation8 + $0x844] ss:$12 sps:$4 sm:$0xff]  }
 0x1fe   :  { %4618 = vmatprep.subr.bf16.mxu1 %v6330_v42  ;;  %v6349_v42 = vld [vmem:[#allocation8 + $0x6c0] ss:$12 sps:$4 sm:$0xff]  }
 0x1ff   :  { %v2276_v50 = vpop.f32.mrf.mxu0 }
 0x200   :  { %4576 = vmatpush2.bf16.msra.mxu0 %v6307_v44  ;;  %v2277_v17 = vadd.f32 %v2276_v50, %v417_v35 }
 0x201   :  { %v2278_v52 = vpop.f32.mrf.mxu0  ;;  %4577 = vmatprep.subr.bf16.mxu0 %v6315_v46  ;;  %4619 = vmatpush2.bf16.msra.mxu1 %v6328_v33  ;;  %v6355_v46 = vld [vmem:[#allocation8 + $0x170] ss:$12 sps:$4 sm:$0xff]   ;;  %v6367_v33 = vld [vmem:[#allocation8 + $0x840] ss:$12 sps:$4 sm:$0xff]  }
 0x202   :  { %v2279_v34 = vadd.f32 %v2278_v52, %v421_v47  ;;  %4620 = vmatprep.subr.bf16.mxu1 %v6336_v49  ;;  %v2320_v41 = vadd.f32 %v6771_v43, %v2277_v17  ;;  %v429_v43 = vrot.slane %v6773_v45, %v396_v15  ;;  %v425_v52 = vrot.slane %v6773_v45, %v6724_v51  ;;  %v6381_v17 = vld [vmem:[#allocation8 + $0xe0] ss:$12 sps:$4 sm:$0xff]  }
 0x203   :  { %v2280_v4 = vpop.f32.mrf.mxu0 }
 0x204   :  { %4578 = vmatpush2.bf16.msra.mxu0 %v6313_v24  ;;  %v2322_v55 = vadd.f32 %v2321_v16, %v2279_v34  ;;  %v2281_v28 = vadd.f32 %v2280_v4, %v417_v35  ;;  %v2422_v49 = vmax.f32 %v2320_v41, 0.0  ;;  %v6356_v16 = vld [vmem:[#allocation8 + $0xb0] ss:$12 sps:$4 sm:$0xff]   ;;  %v6360_v24 = vld [vmem:[#allocation8 + $0x158] ss:$12 sps:$4 sm:$0xff]  }
 0x205   :  { %v2282_v60 = vpop.f32.mrf.mxu0  ;;  %4579 = vmatprep.subr.bf16.mxu0 %v6321_v56  ;;  %4621 = vmatpush2.bf16.msra.mxu1 %v6334_v61  ;;  %v6361_v34 = vld [vmem:[#allocation8 + $0x98] ss:$12 sps:$4 sm:$0xff]   ;;  %v6365_v4 = vld [vmem:[#allocation8 + $0x140] ss:$12 sps:$4 sm:$0xff]   ;;  %v6387_v41 = vld [vmem:[#allocation8 + $0x8] ss:$12 sps:$4 sm:$0xff]  }
 0x206   :  { %v2283_v2 = vadd.f32 %v2282_v60, %v421_v47  ;;  %4622 = vmatprep.subr.bf16.mxu1 %v6342_v57  ;;  %v2423_v11 = vmax.f32 %v2322_v55, 0.0  ;;  %v2324_v37 = vadd.f32 %v2323_v58, %v2281_v28  ;;  %v6372_v47 = vld [vmem:[#allocation8 + $0x2f0] ss:$12 sps:$4 sm:$0xff]   ;;  %v6370_v55 = vld [vmem:[#allocation8 + $0x128] ss:$12 sps:$4 sm:$0xff]  }
 0x207   :  { %v6377_v28 = vld [vmem:[#allocation8 + $0xf8] ss:$12 sps:$4 sm:$0xff]  }
 0x208   :  { %v2326_v7 = vadd.f32 %v2325_v5, %v2283_v2  ;;  %4580 = vmatpush2.bf16.msra.mxu0 %v6319_v59  ;;  %v2434_v44 = vmax.f32 %v2324_v37, 0.0  ;;  %v6383_v37 = vld [vmem:[#allocation8 + $0x20] ss:$12 sps:$4 sm:$0xff]  }
 0x209   :  { %4581 = vmatprep.subr.bf16.mxu0 %v6327_v62  ;;  %4623 = vmatpush2.bf16.msra.mxu1 %v6340_v53  ;;  %v6366_v53 = vld [vmem:[#allocation8 + $0x80] ss:$12 sps:$4 sm:$0xff]  }
 0x20a   :  { %v2435_v13 = vmax.f32 %v2326_v7, 0.0  ;;  %4624 = vmatprep.subr.bf16.mxu1 %v6348_v3  ;;  %v6783_v50 = vpack.c.bf16 %v2434_v44, %v2422_v49  ;;  %v6389_v44 = vld [vmem:[#allocation8 + $0x1d0] ss:$12 sps:$4 sm:$0xff]   ;;  %v6393_v49 = vld [vmem:[#allocation8 + $0x1b8] ss:$12 sps:$4 sm:$0xff]  }
 0x20c   :  { %4582 = vmatpush2.bf16.msra.mxu0 %v6325_v8  ;;  %v6777_v19 = vpack.c.bf16 %v2435_v13, %v2423_v11  ;;  %v6373_v11 = vld [vmem:[#allocation8 + $0x110] ss:$12 sps:$4 sm:$0xff]  }
 0x20d   :  { %4583 = vmatprep.subr.bf16.mxu0 %v6333_v9  ;;  %4625 = vmatpush2.bf16.msra.mxu1 %v6346_v10  ;;  %v6371_v9 = vld [vmem:[#allocation8 + $0x68] ss:$12 sps:$4 sm:$0xff]  }
 0x20e   :  { %4591 = vmatprep.mubr.bf16.mxu0 %v6777_v19  ;;  %4626 = vmatprep.subr.bf16.mxu1 %v6354_v14 }
 0x210   :  { %4584 = vmatpush2.bf16.msra.mxu0 %v6331_v20 }
 0x211   :  { %4585 = vmatprep.subr.bf16.mxu0 %v6339_v21  ;;  %4627 = vmatpush2.bf16.msra.mxu1 %v6352_v23  ;;  %v6374_v23 = vld [vmem:[#allocation8 + $0x230] ss:$12 sps:$4 sm:$0xff]  }
 0x212   :  { %4628 = vmatprep.subr.bf16.mxu1 %v6359_v6  ;;  %v6375_v6 = vld [vmem:[#allocation8 + $0x50] ss:$12 sps:$4 sm:$0xff]  }
 0x214   :  { %4586 = vmatpush2.bf16.msra.mxu0 %v6337_v27  ;;  %v6376_v27 = vld [vmem:[#allocation8 + $0x2d8] ss:$12 sps:$4 sm:$0xff]  }
 0x215   :  { %4587 = vmatprep.subr.bf16.mxu0 %v6345_v29  ;;  %4629 = vmatpush2.bf16.msra.mxu1 %v6357_v31  ;;  %v6378_v29 = vld [vmem:[#allocation8 + $0x218] ss:$12 sps:$4 sm:$0xff]  }
 0x216   :  { %4630 = vmatprep.subr.bf16.mxu1 %v6364_v26  ;;  %v6379_v31 = vld [vmem:[#allocation8 + $0x38] ss:$12 sps:$4 sm:$0xff]   ;;  %v6380_v26 = vld [vmem:[#allocation8 + $0x2c0] ss:$12 sps:$4 sm:$0xff]  }
 0x218   :  { %4588 = vmatpush2.bf16.msra.mxu0 %v6343_v36  ;;  %v6382_v36 = vld [vmem:[#allocation8 + $0x200] ss:$12 sps:$4 sm:$0xff]  }
 0x219   :  { %4589 = vmatprep.subr.bf16.mxu0 %v6351_v38  ;;  %4631 = vmatpush2.bf16.msra.mxu1 %v6362_v39  ;;  %v6384_v38 = vld [vmem:[#allocation8 + $0x2a8] ss:$12 sps:$4 sm:$0xff]  }
 0x21a   :  { %4632 = vmatprep.subr.bf16.mxu1 %v6369_v40  ;;  %v6385_v39 = vld [vmem:[#allocation8 + $0xc8] ss:$12 sps:$4 sm:$0xff]  }
 0x21b   :  { %v6386_v40 = vld [vmem:[#allocation8 + $0x1e8] ss:$12 sps:$4 sm:$0xff]  }
 0x21c   :  { %4590 = vmatpush2.bf16.msra.mxu0 %v6349_v42  ;;  %v6388_v42 = vld [vmem:[#allocation8 + $0x290] ss:$12 sps:$4 sm:$0xff]  }
 0x21d   :  { %5495 = vmatprep.subr.bf16.mxu0 %v6355_v46  ;;  %4633 = vmatpush2.bf16.msra.mxu1 %v6367_v33  ;;  %v6391_v46 = vld [vmem:[#allocation8 + $0x3b0] ss:$12 sps:$4 sm:$0xff]   ;;  %v6392_v33 = vld [vmem:[#allocation8 + $0x278] ss:$12 sps:$4 sm:$0xff]  }
 0x21e   :  { %5517 = vmatprep.subr.bf16.mxu1 %v6372_v47  ;;  %v6394_v47 = vld [vmem:[#allocation8 + $0x458] ss:$12 sps:$4 sm:$0xff]  }
 0x21f   :  { %v2405_v61 = vpop.f32.mrf.mxu0  ;;  %4592 = vmatmul.mubr.bf16.vlgmr.msra.gmra.mxu0 %v6783_v50 }
 0x220   :  { %v2362_v56 = vpop.f32.mrf.mxu1  ;;  %5496 = vmatpush3.bf16.msra.mxu0 %v6356_v16  ;;  %4677 = vmatprep.mubr.bf16.mxu0 %v6704_v22  ;;  %v6395_v16 = vld [vmem:[#allocation8 + $0x398] ss:$12 sps:$4 sm:$0xff]  }
 0x221   :  { %v2407_v58 = vpop.f32.mrf.mxu0  ;;  %5497 = vmatprep.subr.bf16.mxu0 %v6360_v24  ;;  %v2363_v12 = vadd.f32 %v2362_v56, %v425_v52  ;;  %v6396_v24 = vld [vmem:[#allocation8 + $0x260] ss:$12 sps:$4 sm:$0xff]  }
 0x222   :  { %v2364_v57 = vpop.f32.mrf.mxu1  ;;  %v6399_v56 = vld [vmem:[#allocation8 + $0x380] ss:$12 sps:$4 sm:$0xff]  }
 0x223   :  { %v2365_v59 = vadd.f32 %v2364_v57, %v429_v43  ;;  %v2409_v15 = vpop.f32.mrf.mxu0  ;;  %v2406_v7 = vadd.f32 %v2405_v61, %v2363_v12  ;;  %v6400_v61 = vld [vmem:[#allocation8 + $0x248] ss:$12 sps:$4 sm:$0xff]   ;;  %v6408_v12 = vld [vmem:[#allocation8 + $0x5d8] ss:$12 sps:$4 sm:$0xff]  }
 0x224   :  { %v2366_v60 = vpop.f32.mrf.mxu1  ;;  %5498 = vmatpush3.bf16.msra.mxu0 %v6361_v34  ;;  %v6402_v34 = vld [vmem:[#allocation8 + $0x428] ss:$12 sps:$4 sm:$0xff]  }
 0x225   :  { %v2367_v62 = vadd.f32 %v2366_v60, %v425_v52  ;;  %5499 = vmatprep.subr.bf16.mxu0 %v6365_v4  ;;  %v2408_v2 = vadd.f32 %v2407_v58, %v2365_v59  ;;  %v2411_v22 = vpop.f32.mrf.mxu0  ;;  %v2424_v20 = vmax.f32 %v2406_v7, 0.0  ;;  %v6397_v52 = vld [vmem:[#allocation8 + $0x1a0] ss:$12 sps:$4 sm:$0xff]   ;;  %v6403_v57 = vld [vmem:[#allocation8 + $0x368] ss:$12 sps:$4 sm:$0xff]  }
 0x226   :  { %v2368_v45 = vpop.f32.mrf.mxu1  ;;  %v6404_v58 = vld [vmem:[#allocation8 + $0x5f0] ss:$12 sps:$4 sm:$0xff]   ;;  %v6409_v60 = vld [vmem:[#allocation8 + $0x3f8] ss:$12 sps:$4 sm:$0xff]  }
 0x227   :  { %v2410_v3 = vadd.f32 %v2409_v15, %v2367_v62  ;;  %v2369_v5 = vadd.f32 %v2368_v45, %v429_v43  ;;  %v2425_v13 = vmax.f32 %v2408_v2, 0.0  ;;  %v6398_v43 = vld [vmem:[#allocation8 + $0x440] ss:$12 sps:$4 sm:$0xff]   ;;  %v6406_v4 = vld [vmem:[#allocation8 + $0x530] ss:$12 sps:$4 sm:$0xff]  }
 0x228   :  { %5500 = vmatpush3.bf16.msra.mxu0 %v6366_v53  ;;  %v6407_v59 = vld [vmem:[#allocation8 + $0x350] ss:$12 sps:$4 sm:$0xff]   ;;  %v6410_v15 = vld [vmem:[#allocation8 + $0x518] ss:$12 sps:$4 sm:$0xff]   ;;  %v6412_v53 = vld [vmem:[#allocation8 + $0x5c0] ss:$12 sps:$4 sm:$0xff]  }
 0x229   :  { %v2412_v8 = vadd.f32 %v2411_v22, %v2369_v5  ;;  %v2436_v10 = vmax.f32 %v2410_v3, 0.0  ;;  %5501 = vmatprep.subr.bf16.mxu0 %v6370_v55  ;;  %v6411_v62 = vld [vmem:[#allocation8 + $0x338] ss:$12 sps:$4 sm:$0xff]   ;;  %v6413_v45 = vld [vmem:[#allocation8 + $0x3e0] ss:$12 sps:$4 sm:$0xff]  }
 0x22a   :  { %v6414_v55 = vld [vmem:[#allocation8 + $0x500] ss:$12 sps:$4 sm:$0xff]   ;;  %v6416_v3 = vld [vmem:[#allocation8 + $0x5a8] ss:$12 sps:$4 sm:$0xff]   ;;  %v6420_v7 = vld [vmem:[#allocation8 + $0x590] ss:$12 sps:$4 sm:$0xff]  }
 0x22b   :  { %v2437_v14 = vmax.f32 %v2412_v8, 0.0  ;;  %v6794_v35 = vpack.c.bf16 %v2436_v10, %v2424_v20  ;;  %v6415_v2 = vld [vmem:[#allocation8 + $0x320] ss:$12 sps:$4 sm:$0xff]   ;;  %v6417_v5 = vld [vmem:[#allocation8 + $0x3c8] ss:$12 sps:$4 sm:$0xff]  }
 0x22c   :  { %5502 = vmatpush3.bf16.msra.mxu0 %v6371_v9  ;;  %v6422_v22 = vld [vmem:[#allocation8 + $0x770] ss:$12 sps:$4 sm:$0xff]   ;;  %v6424_v10 = vld [vmem:[#allocation8 + $0x578] ss:$12 sps:$4 sm:$0xff]   ;;  %v6428_v20 = vld [vmem:[#allocation8 + $0x560] ss:$12 sps:$4 sm:$0xff]  }
 0x22d   :  { %v6792_v21 = vpack.c.bf16 %v2437_v14, %v2425_v13  ;;  %5503 = vmatprep.subr.bf16.mxu0 %v6373_v11  ;;  %v6421_v8 = vld [vmem:[#allocation8 + $0x4d0] ss:$12 sps:$4 sm:$0xff]   ;;  %v6426_v11 = vld [vmem:[#allocation8 + $0x758] ss:$12 sps:$4 sm:$0xff]  }
 0x22e   :  { %v6423_v9 = vld [vmem:[#allocation8 + $0x6b0] ss:$12 sps:$4 sm:$0xff]   ;;  %v6425_v13 = vld [vmem:[#allocation8 + $0x4b8] ss:$12 sps:$4 sm:$0xff]  }
 0x22f   :  { %4634 = vmatprep.mubr.bf16.mxu1 %v6792_v21  ;;  %v6427_v14 = vld [vmem:[#allocation8 + $0x698] ss:$12 sps:$4 sm:$0xff]  }
 0x230   :  { %4635 = vmatmul.mubr.bf16.vlgmr.msra.gmra.mxu1 %v6794_v35  ;;  %5504 = vmatpush3.bf16.msra.mxu0 %v6375_v6  ;;  %v6429_v6 = vld [vmem:[#allocation8 + $0x4a0] ss:$12 sps:$4 sm:$0xff]  }
 0x231   :  { %5518 = vmatpush3.bf16.msra.mxu1 %v6374_v23  ;;  %4718 = vmatprep.mubr.bf16.mxu1 %v6720_v48  ;;  %v6390_v48 = vld [vmem:[#allocation8 + $0x470] ss:$12 sps:$4 sm:$0xff]   ;;  %v6430_v23 = vld [vmem:[#allocation8 + $0x740] ss:$12 sps:$4 sm:$0xff]  }
 0x232   :  { %5519 = vmatprep.subr.bf16.mxu1 %v6376_v27  ;;  %5505 = vmatprep.subr.bf16.mxu0 %v6377_v28  ;;  %v6431_v27 = vld [vmem:[#allocation8 + $0x680] ss:$12 sps:$4 sm:$0xff]   ;;  %v6432_v28 = vld [vmem:[#allocation8 + $0x548] ss:$12 sps:$4 sm:$0xff]  }
 0x234   :  { %5506 = vmatpush3.bf16.msra.mxu0 %v6379_v31  ;;  %v6435_v31 = vld [vmem:[#allocation8 + $0x668] ss:$12 sps:$4 sm:$0xff]  }
 0x235   :  { %5520 = vmatpush3.bf16.msra.mxu1 %v6378_v29  ;;  %5507 = vmatprep.subr.bf16.mxu0 %v6381_v17  ;;  %v6434_v29 = vld [vmem:[#allocation8 + $0x728] ss:$12 sps:$4 sm:$0xff]   ;;  %v6438_v17 = vld [vmem:[#allocation8 + $0x830] ss:$12 sps:$4 sm:$0xff]  }
 0x236   :  { %5521 = vmatprep.subr.bf16.mxu1 %v6380_v26  ;;  %v6436_v26 = vld [vmem:[#allocation8 + $0x8f0] ss:$12 sps:$4 sm:$0xff]  }
 0x238   :  { %5508 = vmatpush3.bf16.msra.mxu0 %v6383_v37  ;;  %v6440_v37 = vld [vmem:[#allocation8 + $0x8d8] ss:$12 sps:$4 sm:$0xff]  }
 0x239   :  { %5522 = vmatpush3.bf16.msra.mxu1 %v6382_v36  ;;  %5509 = vmatprep.subr.bf16.mxu0 %v6385_v39  ;;  %v6439_v36 = vld [vmem:[#allocation8 + $0x650] ss:$12 sps:$4 sm:$0xff]   ;;  %v6442_v39 = vld [vmem:[#allocation8 + $0x818] ss:$12 sps:$4 sm:$0xff]  }
 0x23a   :  { %5523 = vmatprep.subr.bf16.mxu1 %v6384_v38  ;;  %v6441_v38 = vld [vmem:[#allocation8 + $0x6f8] ss:$12 sps:$4 sm:$0xff]  }
 0x23c   :  { %5510 = vmatpush3.bf16.msra.mxu0 %v6387_v41  ;;  %v6444_v41 = vld [vmem:[#allocation8 + $0x8c0] ss:$12 sps:$4 sm:$0xff]  }
 0x23d   :  { %5524 = vmatpush3.bf16.msra.mxu1 %v6386_v40  ;;  %5539 = vmatprep.subr.bf16.mxu0 %v6390_v48  ;;  %v6443_v40 = vld [vmem:[#allocation8 + $0x638] ss:$12 sps:$4 sm:$0xff]   ;;  %v6446_v48 = vld [vmem:[#allocation8 + $0x800] ss:$12 sps:$4 sm:$0xff]  }
 0x23e   :  { %5525 = vmatprep.subr.bf16.mxu1 %v6388_v42  ;;  %v6445_v42 = vld [vmem:[#allocation8 + $0x6e0] ss:$12 sps:$4 sm:$0xff]  }
 0x23f   :  { %4678 = vmatmul.mubr.bf16.vlgmr.msra.gmra.mxu0 %v6695_v0  ;;  %v6401_v0 = vld [vmem:[#allocation8 + $0x188] ss:$12 sps:$4 sm:$0xff]  }
 0x240   :  { %5540 = vmatpush3.bf16.msra.mxu0 %v6391_v46  ;;  %4759 = vmatprep.mubr.bf16.mxu0 %v6746_v30  ;;  %v6405_v30 = vld [vmem:[#allocation8 + $0x410] ss:$12 sps:$4 sm:$0xff]   ;;  %v6448_v46 = vld [vmem:[#allocation8 + $0x8a8] ss:$12 sps:$4 sm:$0xff]  }
 0x241   :  { %5526 = vmatpush3.bf16.msra.mxu1 %v6389_v44  ;;  %5541 = vmatprep.subr.bf16.mxu0 %v6394_v47  ;;  %v6447_v44 = vld [vmem:[#allocation8 + $0x620] ss:$12 sps:$4 sm:$0xff]   ;;  %v6452_v47 = vld [vmem:[#allocation8 + $0x890] ss:$12 sps:$4 sm:$0xff]  }
 0x242   :  { %5527 = vmatprep.subr.bf16.mxu1 %v6392_v33  ;;  %v6449_v33 = vld [vmem:[#allocation8 + $0x6c8] ss:$12 sps:$4 sm:$0xff]  }
 0x244   :  { %5542 = vmatpush3.bf16.msra.mxu0 %v6395_v16  ;;  %v6454_v16 = vld [vmem:[#allocation8 + $0x878] ss:$12 sps:$4 sm:$0xff]  }
 0x245   :  { %5528 = vmatpush3.bf16.msra.mxu1 %v6393_v49  ;;  %5543 = vmatprep.subr.bf16.mxu0 %v6398_v43  ;;  %v6453_v49 = vld [vmem:[#allocation8 + $0x7d0] ss:$12 sps:$4 sm:$0xff]   ;;  %v6456_v43 = vld [vmem:[#allocation8 + $0x860] ss:$12 sps:$4 sm:$0xff]  }
 0x246   :  { %5529 = vmatprep.subr.bf16.mxu1 %v6396_v24  ;;  %v6455_v24 = vld [vmem:[#allocation8 + $0x7b8] ss:$12 sps:$4 sm:$0xff]  }
 0x248   :  { %5544 = vmatpush3.bf16.msra.mxu0 %v6399_v56  ;;  %v6458_v56 = vld [vmem:[#allocation8 + $0x848] ss:$12 sps:$4 sm:$0xff]  }
 0x249   :  { %5530 = vmatpush3.bf16.msra.mxu1 %v6397_v52  ;;  %5545 = vmatprep.subr.bf16.mxu0 %v6402_v34  ;;  %v6457_v52 = vld [vmem:[#allocation8 + $0x7a0] ss:$12 sps:$4 sm:$0xff]  }
 0x24a   :  { %5531 = vmatprep.subr.bf16.mxu1 %v6400_v61  ;;  %v6459_v61 = vld [vmem:[#allocation8 + $0x788] ss:$12 sps:$4 sm:$0xff]  }
 0x24c   :  { %5546 = vmatpush3.bf16.msra.mxu0 %v6403_v57 }
 0x24d   :  { %5532 = vmatpush3.bf16.msra.mxu1 %v6401_v0  ;;  %5547 = vmatprep.subr.bf16.mxu0 %v6405_v30 }
 0x24e   :  { %5561 = vmatprep.subr.bf16.mxu1 %v6404_v58 }
 0x250   :  { %4719 = vmatmul.mubr.bf16.vlgmr.msra.gmra.mxu1 %v6735_v25  ;;  %5548 = vmatpush3.bf16.msra.mxu0 %v6407_v59  ;;  %v6418_v25 = vld [vmem:[#allocation8 + $0x4e8] ss:$12 sps:$4 sm:$0xff]   ;;  %v6809_v59 = vld [vmem:[#allocation10] sm:$0x7] }
 0x251   :  { %5562 = vmatpush3.bf16.msra.mxu1 %v6406_v4  ;;  %4800 = vmatprep.mubr.bf16.mxu1 %v6756_v32  ;;  %v6419_v32 = vld [vmem:[#allocation8 + $0x308] ss:$12 sps:$4 sm:$0xff]  }
 0x252   :  { %5563 = vmatprep.subr.bf16.mxu1 %v6408_v12  ;;  %5549 = vmatprep.subr.bf16.mxu0 %v6409_v60 }
 0x254   :  { %5550 = vmatpush3.bf16.msra.mxu0 %v6411_v62 }
 0x255   :  { %5564 = vmatpush3.bf16.msra.mxu1 %v6410_v15  ;;  %5551 = vmatprep.subr.bf16.mxu0 %v6413_v45  ;;  %v2839_v15 = vrot.slane %v6809_v59, %v6685_v18  ;;  %v2843_v45 = vrot.slane %v6809_v59, %v6698_v54 }
 0x256   :  { %5565 = vmatprep.subr.bf16.mxu1 %v6412_v53 }
 0x258   :  { %5552 = vmatpush3.bf16.msra.mxu0 %v6415_v2 }
 0x259   :  { %5566 = vmatpush3.bf16.msra.mxu1 %v6414_v55  ;;  %5553 = vmatprep.subr.bf16.mxu0 %v6417_v5 }
 0x25a   :  { %5567 = vmatprep.subr.bf16.mxu1 %v6416_v3 }
 0x25c   :  { %5554 = vmatpush3.bf16.msra.mxu0 %v6419_v32 }
 0x25d   :  { %5568 = vmatpush3.bf16.msra.mxu1 %v6418_v25  ;;  %5583 = vmatprep.subr.bf16.mxu0 %v6422_v22 }
 0x25e   :  { %5569 = vmatprep.subr.bf16.mxu1 %v6420_v7 }
 0x25f   :  { %4760 = vmatmul.mubr.bf16.vlgmr.msra.gmra.mxu0 %v6765_v63  ;;  %v6433_v63 = vld [vmem:[#allocation8 + $0x488] ss:$12 sps:$4 sm:$0xff]   ;;  %v4421_v34 = vpop.f32.mrf.mxu0 }
 0x260   :  { %5584 = vmatpush3.bf16.msra.mxu0 %v6423_v9  ;;  %4841 = vmatprep.mubr.bf16.mxu0 %v6777_v19  ;;  %v6437_v19 = vld [vmem:[#allocation8 + $0x710] ss:$12 sps:$4 sm:$0xff]   ;;  %v4464_v58 = vpop.f32.mrf.mxu1  ;;  %v4422_v55 = vadd.f32 %v4421_v34, %v2839_v15 }
 0x261   :  { %5570 = vmatpush3.bf16.msra.mxu1 %v6421_v8  ;;  %5585 = vmatprep.subr.bf16.mxu0 %v6426_v11  ;;  %v4423_v0 = vpop.f32.mrf.mxu0 }
 0x262   :  { %5571 = vmatprep.subr.bf16.mxu1 %v6424_v10  ;;  %v4424_v3 = vadd.f32 %v4423_v0, %v2843_v45  ;;  %v4465_v32 = vadd.f32 %v4464_v58, %v4422_v55  ;;  %v2847_v58 = vrot.slane %v6809_v59, %v6724_v51 }
 0x263   :  { %v4425_v57 = vpop.f32.mrf.mxu0 }
 0x264   :  { %5586 = vmatpush3.bf16.msra.mxu0 %v6427_v14  ;;  %v4426_v7 = vadd.f32 %v4425_v57, %v2839_v15 }
 0x265   :  { %5572 = vmatpush3.bf16.msra.mxu1 %v6425_v13  ;;  %5587 = vmatprep.subr.bf16.mxu0 %v6430_v23  ;;  %v4427_v30 = vpop.f32.mrf.mxu0 }
 0x266   :  { %5573 = vmatprep.subr.bf16.mxu1 %v6428_v20  ;;  %v4428_v8 = vadd.f32 %v4427_v30, %v2843_v45 }
 0x268   :  { %5588 = vmatpush3.bf16.msra.mxu0 %v6431_v27 }
 0x269   :  { %5574 = vmatpush3.bf16.msra.mxu1 %v6429_v6  ;;  %5589 = vmatprep.subr.bf16.mxu0 %v6434_v29 }
 0x26a   :  { %5575 = vmatprep.subr.bf16.mxu1 %v6432_v28 }
 0x26c   :  { %5590 = vmatpush3.bf16.msra.mxu0 %v6435_v31 }
 0x26d   :  { %5576 = vmatpush3.bf16.msra.mxu1 %v6433_v63  ;;  %5591 = vmatprep.subr.bf16.mxu0 %v6437_v19 }
 0x26e   :  { %5605 = vmatprep.subr.bf16.mxu1 %v6436_v26 }
 0x270   :  { %4801 = vmatmul.mubr.bf16.vlgmr.msra.gmra.mxu1 %v6767_v1  ;;  %5592 = vmatpush3.bf16.msra.mxu0 %v6439_v36  ;;  %v6450_v1 = vld [vmem:[#allocation8 + $0x7e8] ss:$12 sps:$4 sm:$0xff]  }
 0x271   :  { %5606 = vmatpush3.bf16.msra.mxu1 %v6438_v17  ;;  %4882 = vmatprep.mubr.bf16.mxu1 %v6792_v21  ;;  %v6451_v21 = vld [vmem:[#allocation8 + $0x608] ss:$12 sps:$4 sm:$0xff]  }
 0x272   :  { %5607 = vmatprep.subr.bf16.mxu1 %v6440_v37  ;;  %5593 = vmatprep.subr.bf16.mxu0 %v6441_v38 }
 0x274   :  { %5594 = vmatpush3.bf16.msra.mxu0 %v6443_v40 }
 0x275   :  { %5608 = vmatpush3.bf16.msra.mxu1 %v6442_v39  ;;  %5595 = vmatprep.subr.bf16.mxu0 %v6445_v42 }
 0x276   :  { %5609 = vmatprep.subr.bf16.mxu1 %v6444_v41 }
 0x278   :  { %5596 = vmatpush3.bf16.msra.mxu0 %v6447_v44 }
 0x279   :  { %5610 = vmatpush3.bf16.msra.mxu1 %v6446_v48  ;;  %5597 = vmatprep.subr.bf16.mxu0 %v6449_v33 }
 0x27a   :  { %5611 = vmatprep.subr.bf16.mxu1 %v6448_v46 }
 0x27c   :  { %5598 = vmatpush3.bf16.msra.mxu0 %v6451_v21 }
 0x27d   :  { %5612 = vmatpush3.bf16.msra.mxu1 %v6450_v1 }
 0x27e   :  { %5613 = vmatprep.subr.bf16.mxu1 %v6452_v47 }
 0x27f   :  { %4842 = vmatmul.mubr.bf16.vlgmr.msra.gmra.mxu0 %v6783_v50  ;;  %v4466_v50 = vpop.f32.mrf.mxu1 }
 0x280   :  { %v4467_v22 = vadd.f32 %v4466_v50, %v4424_v3 }
 0x281   :  { %5614 = vmatpush3.bf16.msra.mxu1 %v6453_v49  ;;  %v4468_v12 = vpop.f32.mrf.mxu1 }
 0x282   :  { %5615 = vmatprep.subr.bf16.mxu1 %v6454_v16  ;;  %v4469_v13 = vadd.f32 %v4468_v12, %v4426_v7 }
 0x283   :  { %v4470_v62 = vpop.f32.mrf.mxu1 }
 0x284   :  { %v4471_v14 = vadd.f32 %v4470_v62, %v4428_v8 }
 0x285   :  { %5616 = vmatpush3.bf16.msra.mxu1 %v6455_v24 }
 0x286   :  { %5617 = vmatprep.subr.bf16.mxu1 %v6456_v43 }
 0x289   :  { %5618 = vmatpush3.bf16.msra.mxu1 %v6457_v52 }
 0x28a   :  { %5619 = vmatprep.subr.bf16.mxu1 %v6458_v56 }
 0x28d   :  { %5620 = vmatpush3.bf16.msra.mxu1 %v6459_v61 }
 0x290   :  { %4883 = vmatmul.mubr.bf16.vlgmr.msra.gmra.mxu1 %v6794_v35 }
 0x29f   :  { %v4507_v4 = vpop.f32.mrf.mxu0 }
 0x2a0   :  { %v4550_v35 = vpop.f32.mrf.mxu1  ;;  %v4508_v9 = vadd.f32 %v4507_v4, %v4465_v32 }
 0x2a1   :  { %v4509_v60 = vpop.f32.mrf.mxu0 }
 0x2a2   :  { %v4552_v5 = vpop.f32.mrf.mxu1  ;;  %v4510_v18 = vadd.f32 %v4509_v60, %v4467_v22  ;;  %v4551_v20 = vadd.f32 %v4550_v35, %v4508_v9 }
 0x2a3   :  { %v4511_v53 = vpop.f32.mrf.mxu0 }
 0x2a4   :  { %v4554_v10 = vpop.f32.mrf.mxu1  ;;  %v4512_v23 = vadd.f32 %v4511_v53, %v4469_v13  ;;  %v4553_v27 = vadd.f32 %v4552_v5, %v4510_v18 }
 0x2a5   :  { %v4513_v2 = vpop.f32.mrf.mxu0 }
 0x2a6   :  { %v4556_v6 = vpop.f32.mrf.mxu1  ;;  %v4514_v28 = vadd.f32 %v4513_v2, %v4471_v14  ;;  %v4555_v31 = vadd.f32 %v4554_v10, %v4512_v23 }
 0x2a8   :  { %v4557_v37 = vadd.f32 %v4556_v6, %v4514_v28 }
 0x2df   :  { %v4593_v25 = vpop.f32.mrf.mxu0 }
 0x2e0   :  { %v4594_v29 = vadd.f32 %v4593_v25, %v4551_v20 }
 0x2e1   :  { %v4595_v11 = vpop.f32.mrf.mxu0 }
 0x2e2   :  { %v4596_v26 = vadd.f32 %v4595_v11, %v4553_v27 }
 0x2e3   :  { %v4597_v54 = vpop.f32.mrf.mxu0 }
 0x2e4   :  { %v4598_v38 = vadd.f32 %v4597_v54, %v4555_v31 }
 0x2e5   :  { %v4599_v17 = vpop.f32.mrf.mxu0 }
 0x2e6   :  { %v4600_v41 = vadd.f32 %v4599_v17, %v4557_v37 }
 0x2f0   :  { %v4636_v63 = vpop.f32.mrf.mxu1 }
 0x2f1   :  { %v4637_v19 = vadd.f32 %v4636_v63, %v4594_v29 }
 0x2f2   :  { %v4638_v36 = vpop.f32.mrf.mxu1 }
 0x2f3   :  { %4891 = vst [vmem:[#allocation11] sm:$0xff] %v4637_v19  ;;  %v4639_v39 = vadd.f32 %v4638_v36, %v4596_v26 }
 0x2f4   :  { %v4640_v40 = vpop.f32.mrf.mxu1 }
 0x2f5   :  { %4892 = vst [vmem:[#allocation11 + $0x8] sm:$0xff] %v4639_v39  ;;  %v4641_v42 = vadd.f32 %v4640_v40, %v4598_v38 }
 0x2f6   :  { %v4642_v48 = vpop.f32.mrf.mxu1 }
 0x2f7   :  { %4894 = vst [vmem:[#allocation11 + $0x18] sm:$0xff] %v4641_v42  ;;  %v4643_v44 = vadd.f32 %v4642_v48, %v4600_v41 }
 0x2f9   :  { %4895 = vst [vmem:[#allocation11 + $0x20] sm:$0xff] %v4643_v44 }
 0x2ff   :  { %v5511_v46 = vpop.f32.mrf.mxu0 }
 0x301   :  { %v5512_v33 = vpop.f32.mrf.mxu0 }
 0x302   :  { %v5513_v30 = vadd.f32 %v5512_v33, %v5511_v46 }
 0x303   :  { %v5514_v1 = vpop.f32.mrf.mxu0 }
 0x304   :  { %v4680_v60 = vadd.f32 %v5513_v30, %v2847_v58 }
 0x305   :  { %v5515_v21 = vpop.f32.mrf.mxu0 }
 0x306   :  { %v5516_v15 = vadd.f32 %v5515_v21, %v5514_v1 }
 0x308   :  { %v4683_v3 = vadd.f32 %v5516_v15, %v2847_v58 }
 0x310   :  { %v5533_v47 = vpop.f32.mrf.mxu1 }
 0x312   :  { %v5534_v16 = vpop.f32.mrf.mxu1 }
 0x313   :  { %v5535_v4 = vadd.f32 %v5534_v16, %v5533_v47 }
 0x314   :  { %v5536_v43 = vpop.f32.mrf.mxu1 }
 0x315   :  { %v4721_v45 = vadd.f32 %v5535_v4, %v4680_v60 }
 0x316   :  { %v5537_v56 = vpop.f32.mrf.mxu1 }
 0x317   :  { %v5538_v35 = vadd.f32 %v5537_v56, %v5536_v43 }
 0x319   :  { %v4724_v8 = vadd.f32 %v5538_v35, %v4683_v3 }
 0x31f   :  { %v5555_v49 = vpop.f32.mrf.mxu0 }
 0x321   :  { %v5556_v24 = vpop.f32.mrf.mxu0 }
 0x322   :  { %v5557_v62 = vadd.f32 %v5556_v24, %v5555_v49 }
 0x323   :  { %v5558_v52 = vpop.f32.mrf.mxu0 }
 0x324   :  { %v4762_v5 = vadd.f32 %v5557_v62, %v4721_v45 }
 0x325   :  { %v5559_v61 = vpop.f32.mrf.mxu0 }
 0x326   :  { %v5560_v25 = vadd.f32 %v5559_v61, %v5558_v52 }
 0x328   :  { %v4765_v10 = vadd.f32 %v5560_v25, %v4724_v8 }
 0x330   :  { %v5577_v34 = vpop.f32.mrf.mxu1 }
 0x332   :  { %v5578_v57 = vpop.f32.mrf.mxu1 }
 0x333   :  { %v5579_v55 = vadd.f32 %v5578_v57, %v5577_v34 }
 0x334   :  { %v5580_v12 = vpop.f32.mrf.mxu1 }
 0x335   :  { %v4803_v51 = vadd.f32 %v5579_v55, %v4762_v5 }
 0x336   :  { %v5581_v2 = vpop.f32.mrf.mxu1 }
 0x337   :  { %v5582_v59 = vadd.f32 %v5581_v2, %v5580_v12 }
 0x339   :  { %v4806_v20 = vadd.f32 %v5582_v59, %v4765_v10 }
 0x33f   :  { %v5599_v0 = vpop.f32.mrf.mxu0 }
 0x341   :  { %v5600_v50 = vpop.f32.mrf.mxu0 }
 0x342   :  { %v5601_v32 = vadd.f32 %v5600_v50, %v5599_v0 }
 0x343   :  { %v5602_v53 = vpop.f32.mrf.mxu0 }
 0x344   :  { %v4844_v11 = vadd.f32 %v5601_v32, %v4803_v51 }
 0x345   :  { %v5603_v7 = vpop.f32.mrf.mxu0 }
 0x346   :  { %v5604_v13 = vadd.f32 %v5603_v7, %v5602_v53 }
 0x348   :  { %v4847_v54 = vadd.f32 %v5604_v13, %v4806_v20 }
 0x350   :  { %v5621_v22 = vpop.f32.mrf.mxu1 }
 0x352   :  { %v5622_v9 = vpop.f32.mrf.mxu1 }
 0x353   :  { %v5623_v18 = vadd.f32 %v5622_v9, %v5621_v22 }
 0x354   :  { %v5624_v14 = vpop.f32.mrf.mxu1 }
 0x355   :  { %v4885_v23 = vadd.f32 %v5623_v18, %v4844_v11 }
 0x356   :  { %v5625_v6 = vpop.f32.mrf.mxu1 }
 0x357   :  { %4893 = vst [vmem:[#allocation11 + $0x10] sm:$0xff] %v4885_v23  ;;  %v5626_v27 = vadd.f32 %v5625_v6, %v5624_v14 }
 0x359   :  { %v4888_v28 = vadd.f32 %v5626_v27, %v4847_v54 }
 0x35b   :  { %4896 = vst [vmem:[#allocation11 + $0x28] sm:$0xff] %v4888_v28 }
 0x35c   :  { %6575 = shalt.err (!%p6572_p1)
}
 0x35d   :  { %s6603_s21 = smov 384   ;;  %s6604_s22 = smov 24  }
 0x35e   :  { %4908 = dma.vmem_to_hbm [thread:$0]  %s4903_s4, 768, %s6825_s5, [#allocation4], %s6603_s21, %s6603_s21, %s6604_s22  }
 0x35f   :  { %6590 = dma.done.wait [#allocation4], 768  }
 0x360   :  { %6591 = vsyncadd [#allocation4], 4294966528 }
 0x361   :  { %4912 = vsyncpa [#allocation3], 1 }
 0x362   :  { %4913 = vsyncpa [#allocation6], 1 }
 0x363   :  { %4914 = vsyncpa [#allocation9], 1 }
 0x364   :  { %4915 = vsyncpa [#allocation4], 1 }

</bundles_post_ra>
